<compile_context>
chip_gen: v7x
topology: tpu7x:2x2x1
jax: 0.10.0
libtpu: 0.0.40
codegen_flags: <defaults>
</compile_context>

<pallas_src>
import math
import functools

import jax
import jax.numpy as jnp
from jax import lax
from jax.experimental import pallas as pl
from jax.experimental.pallas import tpu as pltpu


def _rot_half(x):
    d = x.shape[-1] // 2
    return jnp.concatenate([-x[:, d:], x[:, :d]], axis=-1)


def block_kernel(x_ref, xq_ref, rot_ref, rotq_ref,
                 wq_ref, wk_ref, wv_ref, wo_ref,
                 wg_ref, wu_ref, wd_ref, g1_ref, g2_ref,
                 o_ref,
                 k_sc, v_sc, attn_ref,
                 *, num_heads, num_kv_heads, head_dim, q_tile, eps):
    S = x_ref.shape[1]
    TQ = q_tile
    Dh = head_dim
    rep = num_heads // num_kv_heads
    scale = 1.0 / math.sqrt(Dh)

    t = pl.program_id(1)
    q_start = t * TQ
    g1 = g1_ref[...]                                   # [1, H]

    # ---- once per batch (tile 0): RMSNorm(x) over the full sequence -> K, V ----
    @pl.when(t == 0)
    def _():
        x_all = x_ref[0]                               # [S, H] f32
        var = jnp.mean(x_all * x_all, axis=-1, keepdims=True)
        xn = (x_all * lax.rsqrt(var + eps)) * g1
        xn_bf = xn.astype(jnp.bfloat16)
        k = jnp.dot(xn_bf, wk_ref[...], preferred_element_type=jnp.float32)  # [S, nKV*Dh]
        v = jnp.dot(xn_bf, wv_ref[...], preferred_element_type=jnp.float32)  # [S, nKV*Dh]
        sin = rot_ref[0]                               # [S, Dh]
        cos = rot_ref[1]
        for g in range(num_kv_heads):                  # rotary once per KV head
            kg = k[:, g * Dh:(g + 1) * Dh]
            kg = kg * cos + _rot_half(kg) * sin
            k_sc[:, g * Dh:(g + 1) * Dh] = kg.astype(jnp.bfloat16)
        v_sc[...] = v.astype(jnp.bfloat16)

    # ---- per query tile: Q projection + rotary ----
    xq = xq_ref[0]                                     # [TQ, H] f32
    var_q = jnp.mean(xq * xq, axis=-1, keepdims=True)
    xn_q = (xq * lax.rsqrt(var_q + eps)) * g1
    q = jnp.dot(xn_q.astype(jnp.bfloat16), wq_ref[...],
                preferred_element_type=jnp.float32)    # [TQ, nH*Dh]

    sin_q = rotq_ref[0]                                # [TQ, Dh]
    cos_q = rotq_ref[1]
    sin_qt = jnp.tile(sin_q, (rep, 1))                 # [rep*TQ, Dh]
    cos_qt = jnp.tile(cos_q, (rep, 1))

    # causal mask shared by all KV groups (finite mask value, no -inf)
    row = lax.broadcasted_iota(jnp.int32, (rep * TQ, S), 0)
    col = lax.broadcasted_iota(jnp.int32, (rep * TQ, S), 1)
    causal = (q_start + (row % TQ)) >= col

    for g in range(num_kv_heads):
        # row-stack the `rep` query heads that share this KV head -> one big matmul
        qg = jnp.concatenate(
            [q[:, (g * rep + r) * Dh:(g * rep + r + 1) * Dh] for r in range(rep)],
            axis=0)                                    # [rep*TQ, Dh]
        qg = (qg * cos_qt + _rot_half(qg) * sin_qt) * scale
        kg = k_sc[:, g * Dh:(g + 1) * Dh]              # [S, Dh] bf16 (rotary applied)
        vg = v_sc[:, g * Dh:(g + 1) * Dh]              # [S, Dh] bf16
        # scores: contract last dims of both operands (no materialized transpose)
        s = lax.dot_general(qg.astype(jnp.bfloat16), kg,
                            (((1,), (1,)), ((), ())),
                            preferred_element_type=jnp.float32)   # [rep*TQ, S]
        s = jnp.where(causal, s, -1e30)
        m = jnp.max(s, axis=-1, keepdims=True)
        p = jnp.exp(s - m)
        l = jnp.sum(p, axis=-1, keepdims=True)
        og = jnp.dot(p.astype(jnp.bfloat16), vg,
                     preferred_element_type=jnp.float32)          # [rep*TQ, Dh]
        og = og * pl.reciprocal(l, approx=True)        # fold 1/l into the smaller output
        # scatter head results into the lane-dense attention slab
        for r in range(rep):
            h = g * rep + r
            attn_ref[:, h * Dh:(h + 1) * Dh] = og[r * TQ:(r + 1) * TQ, :]

    attn_bf = attn_ref[...].astype(jnp.bfloat16)       # [TQ, H]
    y = jnp.dot(attn_bf, wo_ref[...], preferred_element_type=jnp.float32)
    x1 = xq + y

    # ---- post-attention RMSNorm + SwiGLU MLP ----
    var2 = jnp.mean(x1 * x1, axis=-1, keepdims=True)
    xn2 = (x1 * lax.rsqrt(var2 + eps)) * g2_ref[...]
    xn2_bf = xn2.astype(jnp.bfloat16)
    gate = jnp.dot(xn2_bf, wg_ref[...], preferred_element_type=jnp.float32)
    up = jnp.dot(xn2_bf, wu_ref[...], preferred_element_type=jnp.float32)
    act = gate * jax.nn.sigmoid(gate) * up             # silu(gate) * up, f32
    mlp = jnp.dot(act.astype(jnp.bfloat16), wd_ref[...],
                  preferred_element_type=jnp.float32)

    o_ref[0] = x1 + mlp


def block_forward(x, rotary, params, *, num_heads, num_kv_heads, eps=1e-6, q_tile=None):
    B, S, H = x.shape
    head_dim = H // num_heads
    Dh = head_dim
    KV = num_kv_heads * Dh
    TQ = q_tile if q_tile is not None else min(S, 128)
    assert S % TQ == 0

    # pre-transpose to [in, out] and pre-cast to bf16 (MXU operands, half the VMEM/DMA)
    to_bf = lambda w: w.T.astype(jnp.bfloat16)
    wq_t, wk_t, wv_t = to_bf(params["wq"]), to_bf(params["wk"]), to_bf(params["wv"])
    wo_t, wg_t, wu_t = to_bf(params["wo"]), to_bf(params["wg"]), to_bf(params["wu"])
    wd_t = to_bf(params["wd"])
    g1 = params["g1"].reshape(1, H).astype(jnp.float32)
    g2 = params["g2"].reshape(1, H).astype(jnp.float32)

    kernel = functools.partial(
        block_kernel, num_heads=num_heads, num_kv_heads=num_kv_heads,
        head_dim=head_dim, q_tile=TQ, eps=eps)

    def const(arr):
        return pl.BlockSpec(arr.shape, lambda b, t: (0,) * arr.ndim)

    return pl.pallas_call(
        kernel,
        out_shape=jax.ShapeDtypeStruct((B, S, H), jnp.float32),
        grid=(B, S // TQ),
        in_specs=[
            pl.BlockSpec((1, S, H), lambda b, t: (b, 0, 0)),    # x full seq (for K/V)
            pl.BlockSpec((1, TQ, H), lambda b, t: (b, t, 0)),   # x query tile
            const(rotary),                                      # rotary full  [2, S, Dh]
            pl.BlockSpec((2, TQ, Dh), lambda b, t: (0, t, 0)),  # rotary q-tile
            const(wq_t), const(wk_t), const(wv_t), const(wo_t),
            const(wg_t), const(wu_t), const(wd_t),
            const(g1), const(g2),
        ],
        out_specs=pl.BlockSpec((1, TQ, H), lambda b, t: (b, t, 0)),
        scratch_shapes=[
            pltpu.VMEM((S, KV), jnp.bfloat16),                  # K cache (rotary applied)
            pltpu.VMEM((S, KV), jnp.bfloat16),                  # V cache
            pltpu.VMEM((TQ, H), jnp.float32),                   # attention output slab
        ],
        compiler_params=pltpu.CompilerParams(
            dimension_semantics=("parallel", "arbitrary"),
            vmem_limit_bytes=64 * 1024 * 1024),
    )(x, x, rotary, rotary, wq_t, wk_t, wv_t, wo_t, wg_t, wu_t, wd_t, g1, g2)


# ---------------- plain-JAX reference (mirrors the PyTorch code, f32) ----------------
def _rotate_half_ref(x):
    d = x.shape[-1] // 2
    return jnp.concatenate([-x[..., d:], x[..., :d]], axis=-1)


def ref_block(x, rotary, params, *, num_heads, num_kv_heads, eps=1e-6):
    B, S, H = x.shape
    Dh = H // num_heads

    def rmsnorm(v, w):
        var = jnp.mean(v.astype(jnp.float32) ** 2, axis=-1, keepdims=True)
        return w * (v * jax.lax.rsqrt(var + eps))

    xn = rmsnorm(x, params["g1"])
    q = (xn @ params["wq"].T).reshape(B, S, num_heads, Dh)
    k = (xn @ params["wk"].T).reshape(B, S, num_kv_heads, Dh)
    v = (xn @ params["wv"].T).reshape(B, S, num_kv_heads, Dh)
    sin = rotary[0][None, :, None, :]
    cos = rotary[1][None, :, None, :]
    q = q * cos + _rotate_half_ref(q) * sin
    k = k * cos + _rotate_half_ref(k) * sin
    rep = num_heads // num_kv_heads
    k = jnp.repeat(k, rep, axis=-2)
    v = jnp.repeat(v, rep, axis=-2)
    q, k, v = (jnp.swapaxes(t, 1, 2) for t in (q, k, v))       # [B, nH, S, Dh]
    s = jnp.einsum("bhqd,bhkd->bhqk", q, k) / math.sqrt(Dh)
    mask = jnp.tril(jnp.ones((S, S), dtype=bool))
    s = jnp.where(mask, s, -jnp.inf)
    p = jax.nn.softmax(s, axis=-1)
    y = jnp.einsum("bhqk,bhkd->bhqd", p, v)
    y = jnp.swapaxes(y, 1, 2).reshape(B, S, H)
    x1 = x + y @ params["wo"].T
    xn2 = rmsnorm(x1, params["g2"])
    gate = xn2 @ params["wg"].T
    up = xn2 @ params["wu"].T
    mlp = (jax.nn.silu(gate) * up) @ params["wd"].T
    return x1 + mlp


if __name__ == "__main__":
    B, S, H = 2, 16, 32
    NH, NKV = 4, 2
    I = 64
    Dh = H // NH
    TQ = 8                      # two query tiles -> non-trivial second grid axis

    key = jax.random.PRNGKey(0)
    keys = jax.random.split(key, 10)
    x = jax.random.normal(keys[0], (B, S, H), dtype=jnp.float32)

    # rotary table: [2, S, Dh], rotary[0]=sin, rotary[1]=cos
    inv_freq = 1.0 / (10000.0 ** (jnp.arange(0, Dh, 2, dtype=jnp.float32) / Dh))
    angles = jnp.arange(S, dtype=jnp.float32)[:, None] * inv_freq[None, :]   # [S, Dh/2]
    emb = jnp.concatenate([angles, angles], axis=-1)                          # [S, Dh]
    rotary = jnp.stack([jnp.sin(emb), jnp.cos(emb)], axis=0)                  # [2, S, Dh]

    init = lambda k, shape: (0.05 * jax.random.normal(k, shape)).astype(jnp.float32)
    params = {
        "wq": init(keys[1], (NH * Dh, H)),
        "wk": init(keys[2], (NKV * Dh, H)),
        "wv": init(keys[3], (NKV * Dh, H)),
        "wo": init(keys[4], (H, H)),
        "wg": init(keys[5], (I, H)),
        "wu": init(keys[6], (I, H)),
        "wd": init(keys[7], (H, I)),
        "g1": jnp.ones((H,), dtype=jnp.float32) + 0.1 * jax.random.normal(keys[8], (H,)),
        "g2": jnp.ones((H,), dtype=jnp.float32) + 0.1 * jax.random.normal(keys[9], (H,)),
    }

    out = block_forward(x, rotary, params, num_heads=NH, num_kv_heads=NKV, q_tile=TQ)
    out = jax.block_until_ready(out)

    ref = ref_block(x, rotary, params, num_heads=NH, num_kv_heads=NKV)
    assert out.shape == (B, S, H)
    err = float(jnp.max(jnp.abs(out - ref)))
    # bf16 MXU operands + approx reciprocal -> compare with a bf16-appropriate tolerance
    assert jnp.allclose(out, ref, atol=2e-2, rtol=2e-2), err

    print("KERNEL_OK")
</pallas_src>

<mosaic_0001>
module attributes {stable_mosaic.version = 11 : i64} {
  func.func @block_kernel(%arg0: i32, %arg1: i32, %arg2: memref<1x16x32xf32, #tpu.memory_space<vmem>>, %arg3: memref<1x8x32xf32, #tpu.memory_space<vmem>>, %arg4: memref<2x16x8xf32, #tpu.memory_space<vmem>>, %arg5: memref<2x8x8xf32, #tpu.memory_space<vmem>>, %arg6: memref<32x32xbf16, #tpu.memory_space<vmem>>, %arg7: memref<32x16xbf16, #tpu.memory_space<vmem>>, %arg8: memref<32x16xbf16, #tpu.memory_space<vmem>>, %arg9: memref<32x32xbf16, #tpu.memory_space<vmem>>, %arg10: memref<32x64xbf16, #tpu.memory_space<vmem>>, %arg11: memref<32x64xbf16, #tpu.memory_space<vmem>>, %arg12: memref<64x32xbf16, #tpu.memory_space<vmem>>, %arg13: memref<1x32xf32, #tpu.memory_space<vmem>>, %arg14: memref<1x32xf32, #tpu.memory_space<vmem>>, %arg15: memref<1x8x32xf32, #tpu.memory_space<vmem>>, %arg16: memref<16x16xbf16, #tpu.memory_space<vmem>>, %arg17: memref<16x16xbf16, #tpu.memory_space<vmem>>, %arg18: memref<8x32xf32, #tpu.memory_space<vmem>>) attributes {dimension_semantics = [#tpu.dimension_semantics<parallel>, #tpu.dimension_semantics<arbitrary>], iteration_bounds = array<i64: 2, 2>, scalar_prefetch = 0 : i64, scratch_operands = 3 : i64, tpu.core_type = #tpu.core_type<tc>, window_params = [{transform_indices = @transform_0, window_bounds = array<i64: 1, 16, 32>}, {transform_indices = @transform_1, window_bounds = array<i64: 1, 8, 32>}, {pipeline_mode = #tpu.pipeline_mode<synchronous>, transform_indices = @transform_2, window_bounds = array<i64: 2, 16, 8>}, {transform_indices = @transform_3, window_bounds = array<i64: 2, 8, 8>}, {pipeline_mode = #tpu.pipeline_mode<synchronous>, transform_indices = @transform_4, window_bounds = array<i64: 32, 32>}, {pipeline_mode = #tpu.pipeline_mode<synchronous>, transform_indices = @transform_5, window_bounds = array<i64: 32, 16>}, {pipeline_mode = #tpu.pipeline_mode<synchronous>, transform_indices = @transform_6, window_bounds = array<i64: 32, 16>}, {pipeline_mode = #tpu.pipeline_mode<synchronous>, transform_indices = @transform_7, window_bounds = array<i64: 32, 32>}, {pipeline_mode = #tpu.pipeline_mode<synchronous>, transform_indices = @transform_8, window_bounds = array<i64: 32, 64>}, {pipeline_mode = #tpu.pipeline_mode<synchronous>, transform_indices = @transform_9, window_bounds = array<i64: 32, 64>}, {pipeline_mode = #tpu.pipeline_mode<synchronous>, transform_indices = @transform_10, window_bounds = array<i64: 64, 32>}, {pipeline_mode = #tpu.pipeline_mode<synchronous>, transform_indices = @transform_11, window_bounds = array<i64: 1, 32>}, {pipeline_mode = #tpu.pipeline_mode<synchronous>, transform_indices = @transform_12, window_bounds = array<i64: 1, 32>}, {transform_indices = @transform_13, window_bounds = array<i64: 1, 8, 32>}]} {
    %c8_i32 = arith.constant 8 : i32
    %0 = arith.muli %arg1, %c8_i32 : i32
    %c0 = arith.constant 0 : index
    %c0_0 = arith.constant 0 : index
    %1 = vector.load %arg13[%c0, %c0_0] : memref<1x32xf32, #tpu.memory_space<vmem>>, vector<1x32xf32>
    %c0_i32 = arith.constant 0 : i32
    %2 = arith.cmpi eq, %arg1, %c0_i32 : i32
    %3 = arith.extui %2 : i1 to i32
    %c0_i32_1 = arith.constant 0 : i32
    %4 = arith.cmpi ne, %3, %c0_i32_1 : i32
    scf.if %4 {
      %c0_70 = arith.constant 0 : index
      %c0_71 = arith.constant 0 : index
      %c0_72 = arith.constant 0 : index
      %156 = vector.load %arg2[%c0_70, %c0_71, %c0_72] : memref<1x16x32xf32, #tpu.memory_space<vmem>>, vector<1x16x32xf32>
      %157 = vector.shape_cast %156 : vector<1x16x32xf32> to vector<16x32xf32>
      %158 = arith.mulf %157, %157 : vector<16x32xf32>
      %cst_73 = arith.constant dense<0.000000e+00> : vector<16xf32>
      %159 = vector.multi_reduction <add>, %158, %cst_73 [1] : vector<16x32xf32> to vector<16xf32>
      %160 = vector.shape_cast %159 : vector<16xf32> to vector<16x1xf32>
      %cst_74 = arith.constant 3.200000e+01 : f32
      %161 = vector.broadcast %cst_74 : f32 to vector<16x1xf32>
      %162 = arith.divf %160, %161 : vector<16x1xf32>
      %cst_75 = arith.constant 9.99999997E-7 : f32
      %163 = vector.broadcast %cst_75 : f32 to vector<16x1xf32>
      %164 = arith.addf %162, %163 : vector<16x1xf32>
      %165 = math.rsqrt %164 : vector<16x1xf32>
      %166 = vector.broadcast %165 : vector<16x1xf32> to vector<16x32xf32>
      %167 = arith.mulf %157, %166 : vector<16x32xf32>
      %168 = vector.broadcast %1 : vector<1x32xf32> to vector<16x32xf32>
      %169 = arith.mulf %167, %168 : vector<16x32xf32>
      %170 = arith.truncf %169 : vector<16x32xf32> to vector<16x32xbf16>
      %c0_76 = arith.constant 0 : index
      %c0_77 = arith.constant 0 : index
      %171 = vector.load %arg7[%c0_76, %c0_77] : memref<32x16xbf16, #tpu.memory_space<vmem>>, vector<32x16xbf16>
      %cst_78 = arith.constant dense<0.000000e+00> : vector<16x16xf32>
      %172 = tpu.matmul %170, %171, %cst_78 {dimension_numbers = #tpu.dot_dimension_numbers<[1], [0], [0], [1], [0, 0, 1, 1], [], []>} : vector<16x32xbf16>, vector<32x16xbf16>, vector<16x16xf32> -> vector<16x16xf32>
      %c0_79 = arith.constant 0 : index
      %c0_80 = arith.constant 0 : index
      %173 = vector.load %arg8[%c0_79, %c0_80] : memref<32x16xbf16, #tpu.memory_space<vmem>>, vector<32x16xbf16>
      %cst_81 = arith.constant dense<0.000000e+00> : vector<16x16xf32>
      %174 = tpu.matmul %170, %173, %cst_81 {dimension_numbers = #tpu.dot_dimension_numbers<[1], [0], [0], [1], [0, 0, 1, 1], [], []>} : vector<16x32xbf16>, vector<32x16xbf16>, vector<16x16xf32> -> vector<16x16xf32>
      %c0_82 = arith.constant 0 : index
      %c0_83 = arith.constant 0 : index
      %c0_84 = arith.constant 0 : index
      %175 = vector.load %arg4[%c0_82, %c0_83, %c0_84] : memref<2x16x8xf32, #tpu.memory_space<vmem>>, vector<1x16x8xf32>
      %176 = vector.shape_cast %175 : vector<1x16x8xf32> to vector<16x8xf32>
      %c1_85 = arith.constant 1 : index
      %c0_86 = arith.constant 0 : index
      %c0_87 = arith.constant 0 : index
      %177 = vector.load %arg4[%c1_85, %c0_86, %c0_87] : memref<2x16x8xf32, #tpu.memory_space<vmem>>, vector<1x16x8xf32>
      %178 = vector.shape_cast %177 : vector<1x16x8xf32> to vector<16x8xf32>
      %179 = vector.extract_strided_slice %172 {offsets = [0, 0], sizes = [16, 8], strides = [1, 1]} : vector<16x16xf32> to vector<16x8xf32>
      %180 = arith.mulf %179, %178 : vector<16x8xf32>
      %181 = vector.extract_strided_slice %179 {offsets = [0, 4], sizes = [16, 4], strides = [1, 1]} : vector<16x8xf32> to vector<16x4xf32>
      %cst_88 = arith.constant 0.000000e+00 : f32
      %182 = vector.broadcast %cst_88 : f32 to vector<16x4xf32>
      %183 = arith.subf %182, %181 : vector<16x4xf32>
      %184 = vector.extract_strided_slice %179 {offsets = [0, 0], sizes = [16, 4], strides = [1, 1]} : vector<16x8xf32> to vector<16x4xf32>
      %185 = tpu.concatenate %183, %184 in 1 : vector<16x4xf32>, vector<16x4xf32> -> vector<16x8xf32>
      %186 = arith.mulf %185, %176 : vector<16x8xf32>
      %187 = arith.addf %180, %186 : vector<16x8xf32>
      %188 = arith.truncf %187 : vector<16x8xf32> to vector<16x8xbf16>
      %c0_89 = arith.constant 0 : index
      %c0_90 = arith.constant 0 : index
      %189 = vector.load %arg16[%c0_89, %c0_90] : memref<16x16xbf16, #tpu.memory_space<vmem>>, vector<16x8xbf16>
      tpu.vector_store %arg16[%c0_89, %c0_90], %188 {strides = array<i32>} : memref<16x16xbf16, #tpu.memory_space<vmem>>, vector<16x8xbf16>,
      %190 = vector.extract_strided_slice %172 {offsets = [0, 8], sizes = [16, 8], strides = [1, 1]} : vector<16x16xf32> to vector<16x8xf32>
      %191 = arith.mulf %190, %178 : vector<16x8xf32>
      %192 = vector.extract_strided_slice %190 {offsets = [0, 4], sizes = [16, 4], strides = [1, 1]} : vector<16x8xf32> to vector<16x4xf32>
      %cst_91 = arith.constant 0.000000e+00 : f32
      %193 = vector.broadcast %cst_91 : f32 to vector<16x4xf32>
      %194 = arith.subf %193, %192 : vector<16x4xf32>
      %195 = vector.extract_strided_slice %190 {offsets = [0, 0], sizes = [16, 4], strides = [1, 1]} : vector<16x8xf32> to vector<16x4xf32>
      %196 = tpu.concatenate %194, %195 in 1 : vector<16x4xf32>, vector<16x4xf32> -> vector<16x8xf32>
      %197 = arith.mulf %196, %176 : vector<16x8xf32>
      %198 = arith.addf %191, %197 : vector<16x8xf32>
      %199 = arith.truncf %198 : vector<16x8xf32> to vector<16x8xbf16>
      %c0_92 = arith.constant 0 : index
      %c8_93 = arith.constant 8 : index
      %200 = vector.load %arg16[%c0_92, %c8_93] : memref<16x16xbf16, #tpu.memory_space<vmem>>, vector<16x8xbf16>
      tpu.vector_store %arg16[%c0_92, %c8_93], %199 {strides = array<i32>} : memref<16x16xbf16, #tpu.memory_space<vmem>>, vector<16x8xbf16>,
      %201 = arith.truncf %174 : vector<16x16xf32> to vector<16x16xbf16>
      %c0_94 = arith.constant 0 : index
      %c0_95 = arith.constant 0 : index
      %202 = vector.load %arg17[%c0_94, %c0_95] : memref<16x16xbf16, #tpu.memory_space<vmem>>, vector<16x16xbf16>
      tpu.vector_store %arg17[%c0_94, %c0_95], %201 {strides = array<i32>} : memref<16x16xbf16, #tpu.memory_space<vmem>>, vector<16x16xbf16>,
    } else {
    }
    %c0_2 = arith.constant 0 : index
    %c0_3 = arith.constant 0 : index
    %c0_4 = arith.constant 0 : index
    %5 = vector.load %arg3[%c0_2, %c0_3, %c0_4] : memref<1x8x32xf32, #tpu.memory_space<vmem>>, vector<1x8x32xf32>
    %6 = vector.shape_cast %5 : vector<1x8x32xf32> to vector<8x32xf32>
    %7 = arith.mulf %6, %6 : vector<8x32xf32>
    %cst = arith.constant dense<0.000000e+00> : vector<8xf32>
    %8 = vector.multi_reduction <add>, %7, %cst [1] : vector<8x32xf32> to vector<8xf32>
    %9 = vector.shape_cast %8 : vector<8xf32> to vector<8x1xf32>
    %cst_5 = arith.constant 3.200000e+01 : f32
    %10 = vector.broadcast %cst_5 : f32 to vector<8x1xf32>
    %11 = arith.divf %9, %10 : vector<8x1xf32>
    %cst_6 = arith.constant 9.99999997E-7 : f32
    %12 = vector.broadcast %cst_6 : f32 to vector<8x1xf32>
    %13 = arith.addf %11, %12 : vector<8x1xf32>
    %14 = math.rsqrt %13 : vector<8x1xf32>
    %15 = vector.broadcast %14 : vector<8x1xf32> to vector<8x32xf32>
    %16 = arith.mulf %6, %15 : vector<8x32xf32>
    %17 = vector.broadcast %1 : vector<1x32xf32> to vector<8x32xf32>
    %18 = arith.mulf %16, %17 : vector<8x32xf32>
    %19 = arith.truncf %18 : vector<8x32xf32> to vector<8x32xbf16>
    %c0_7 = arith.constant 0 : index
    %c0_8 = arith.constant 0 : index
    %20 = vector.load %arg6[%c0_7, %c0_8] : memref<32x32xbf16, #tpu.memory_space<vmem>>, vector<32x32xbf16>
    %cst_9 = arith.constant dense<0.000000e+00> : vector<8x32xf32>
    %21 = tpu.matmul %19, %20, %cst_9 {dimension_numbers = #tpu.dot_dimension_numbers<[1], [0], [0], [1], [0, 0, 1, 1], [], []>} : vector<8x32xbf16>, vector<32x32xbf16>, vector<8x32xf32> -> vector<8x32xf32>
    %c0_10 = arith.constant 0 : index
    %c0_11 = arith.constant 0 : index
    %c0_12 = arith.constant 0 : index
    %22 = vector.load %arg5[%c0_10, %c0_11, %c0_12] : memref<2x8x8xf32, #tpu.memory_space<vmem>>, vector<1x8x8xf32>
    %23 = vector.shape_cast %22 : vector<1x8x8xf32> to vector<8x8xf32>
    %c1 = arith.constant 1 : index
    %c0_13 = arith.constant 0 : index
    %c0_14 = arith.constant 0 : index
    %24 = vector.load %arg5[%c1, %c0_13, %c0_14] : memref<2x8x8xf32, #tpu.memory_space<vmem>>, vector<1x8x8xf32>
    %25 = vector.shape_cast %24 : vector<1x8x8xf32> to vector<8x8xf32>
    %26 = tpu.concatenate %23, %23 in 0 : vector<8x8xf32>, vector<8x8xf32> -> vector<16x8xf32>
    %27 = tpu.concatenate %25, %25 in 0 : vector<8x8xf32>, vector<8x8xf32> -> vector<16x8xf32>
    %28 = tpu.iota {dimensions = array<i32: 0>} : vector<16x16xi32>
    %29 = tpu.iota {dimensions = array<i32: 1>} : vector<16x16xi32>
    %c8_i32_15 = arith.constant 8 : i32
    %c0_i32_16 = arith.constant 0 : i32
    %30 = arith.cmpi eq, %c8_i32_15, %c0_i32_16 : i32
    %c1_i32 = arith.constant 1 : i32
    %31 = arith.select %30, %c1_i32, %c8_i32_15 : i32
    %32 = vector.broadcast %31 : i32 to vector<16x16xi32>
    %33 = arith.remsi %28, %32 : vector<16x16xi32>
    %c0_i32_17 = arith.constant 0 : i32
    %34 = vector.broadcast %c0_i32_17 : i32 to vector<16x16xi32>
    %35 = arith.cmpi ne, %33, %34 : vector<16x16xi32>
    %c0_i32_18 = arith.constant 0 : i32
    %36 = vector.broadcast %c0_i32_18 : i32 to vector<16x16xi32>
    %37 = arith.cmpi slt, %33, %36 : vector<16x16xi32>
    %c0_i32_19 = arith.constant 0 : i32
    %38 = arith.cmpi slt, %31, %c0_i32_19 : i32
    %39 = vector.broadcast %38 : i1 to vector<16x16xi1>
    %40 = vector.broadcast %39 : vector<16x16xi1> to vector<16x16xi1>
    %41 = arith.xori %37, %40 : vector<16x16xi1>
    %42 = arith.andi %41, %35 : vector<16x16xi1>
    %43 = vector.broadcast %31 : i32 to vector<16x16xi32>
    %44 = arith.addi %33, %43 : vector<16x16xi32>
    %45 = arith.select %42, %44, %33 : vector<16x16xi1>, vector<16x16xi32>
    %46 = vector.broadcast %0 : i32 to vector<16x16xi32>
    %47 = arith.addi %46, %45 : vector<16x16xi32>
    %48 = arith.cmpi sge, %47, %29 : vector<16x16xi32>
    %49 = vector.extract_strided_slice %21 {offsets = [0, 0], sizes = [8, 8], strides = [1, 1]} : vector<8x32xf32> to vector<8x8xf32>
    %50 = vector.extract_strided_slice %21 {offsets = [0, 8], sizes = [8, 8], strides = [1, 1]} : vector<8x32xf32> to vector<8x8xf32>
    %51 = tpu.concatenate %49, %50 in 0 : vector<8x8xf32>, vector<8x8xf32> -> vector<16x8xf32>
    %52 = arith.mulf %51, %27 : vector<16x8xf32>
    %53 = vector.extract_strided_slice %51 {offsets = [0, 4], sizes = [16, 4], strides = [1, 1]} : vector<16x8xf32> to vector<16x4xf32>
    %cst_20 = arith.constant 0.000000e+00 : f32
    %54 = vector.broadcast %cst_20 : f32 to vector<16x4xf32>
    %55 = arith.subf %54, %53 : vector<16x4xf32>
    %56 = vector.extract_strided_slice %51 {offsets = [0, 0], sizes = [16, 4], strides = [1, 1]} : vector<16x8xf32> to vector<16x4xf32>
    %57 = tpu.concatenate %55, %56 in 1 : vector<16x4xf32>, vector<16x4xf32> -> vector<16x8xf32>
    %58 = arith.mulf %57, %26 : vector<16x8xf32>
    %59 = arith.addf %52, %58 : vector<16x8xf32>
    %cst_21 = arith.constant 0.353553385 : f32
    %60 = vector.broadcast %cst_21 : f32 to vector<16x8xf32>
    %61 = arith.mulf %59, %60 : vector<16x8xf32>
    %c0_22 = arith.constant 0 : index
    %c0_23 = arith.constant 0 : index
    %62 = vector.load %arg16[%c0_22, %c0_23] : memref<16x16xbf16, #tpu.memory_space<vmem>>, vector<16x8xbf16>
    %c0_24 = arith.constant 0 : index
    %c0_25 = arith.constant 0 : index
    %63 = vector.load %arg17[%c0_24, %c0_25] : memref<16x16xbf16, #tpu.memory_space<vmem>>, vector<16x8xbf16>
    %64 = arith.truncf %61 : vector<16x8xf32> to vector<16x8xbf16>
    %cst_26 = arith.constant dense<0.000000e+00> : vector<16x16xf32>
    %65 = tpu.matmul %64, %62, %cst_26 {dimension_numbers = #tpu.dot_dimension_numbers<[1], [1], [0], [0], [0, 0, 1, 0], [], []>} : vector<16x8xbf16>, vector<16x8xbf16>, vector<16x16xf32> -> vector<16x16xf32>
    %cst_27 = arith.constant -1.000000e+30 : f32
    %66 = vector.broadcast %cst_27 : f32 to vector<16x16xf32>
    %67 = arith.select %48, %65, %66 : vector<16x16xi1>, vector<16x16xf32>
    %cst_28 = arith.constant dense<0xFF800000> : vector<16xf32>
    %68 = vector.multi_reduction <maximumf>, %67, %cst_28 [1] : vector<16x16xf32> to vector<16xf32>
    %69 = vector.shape_cast %68 : vector<16xf32> to vector<16x1xf32>
    %70 = vector.broadcast %69 : vector<16x1xf32> to vector<16x16xf32>
    %71 = arith.subf %67, %70 : vector<16x16xf32>
    %72 = math.exp %71 : vector<16x16xf32>
    %cst_29 = arith.constant dense<0.000000e+00> : vector<16xf32>
    %73 = vector.multi_reduction <add>, %72, %cst_29 [1] : vector<16x16xf32> to vector<16xf32>
    %74 = vector.shape_cast %73 : vector<16xf32> to vector<16x1xf32>
    %75 = arith.truncf %72 : vector<16x16xf32> to vector<16x16xbf16>
    %cst_30 = arith.constant dense<0.000000e+00> : vector<16x8xf32>
    %76 = tpu.matmul %75, %63, %cst_30 {dimension_numbers = #tpu.dot_dimension_numbers<[1], [0], [0], [1], [0, 0, 1, 1], [], []>} : vector<16x16xbf16>, vector<16x8xbf16>, vector<16x8xf32> -> vector<16x8xf32>
    %77 = tpu.reciprocal %74 {approx = true} : vector<16x1xf32> -> vector<16x1xf32>
    %78 = vector.broadcast %77 : vector<16x1xf32> to vector<16x8xf32>
    %79 = arith.mulf %76, %78 : vector<16x8xf32>
    %80 = vector.extract_strided_slice %79 {offsets = [0, 0], sizes = [8, 8], strides = [1, 1]} : vector<16x8xf32> to vector<8x8xf32>
    %c0_31 = arith.constant 0 : index
    %c0_32 = arith.constant 0 : index
    %81 = vector.load %arg18[%c0_31, %c0_32] : memref<8x32xf32, #tpu.memory_space<vmem>>, vector<8x8xf32>
    tpu.vector_store %arg18[%c0_31, %c0_32], %80 {strides = array<i32>} : memref<8x32xf32, #tpu.memory_space<vmem>>, vector<8x8xf32>,
    %82 = vector.extract_strided_slice %79 {offsets = [8, 0], sizes = [8, 8], strides = [1, 1]} : vector<16x8xf32> to vector<8x8xf32>
    %c0_33 = arith.constant 0 : index
    %c8 = arith.constant 8 : index
    %83 = vector.load %arg18[%c0_33, %c8] : memref<8x32xf32, #tpu.memory_space<vmem>>, vector<8x8xf32>
    tpu.vector_store %arg18[%c0_33, %c8], %82 {strides = array<i32>} : memref<8x32xf32, #tpu.memory_space<vmem>>, vector<8x8xf32>,
    %84 = vector.extract_strided_slice %21 {offsets = [0, 16], sizes = [8, 8], strides = [1, 1]} : vector<8x32xf32> to vector<8x8xf32>
    %85 = vector.extract_strided_slice %21 {offsets = [0, 24], sizes = [8, 8], strides = [1, 1]} : vector<8x32xf32> to vector<8x8xf32>
    %86 = tpu.concatenate %84, %85 in 0 : vector<8x8xf32>, vector<8x8xf32> -> vector<16x8xf32>
    %87 = arith.mulf %86, %27 : vector<16x8xf32>
    %88 = vector.extract_strided_slice %86 {offsets = [0, 4], sizes = [16, 4], strides = [1, 1]} : vector<16x8xf32> to vector<16x4xf32>
    %cst_34 = arith.constant 0.000000e+00 : f32
    %89 = vector.broadcast %cst_34 : f32 to vector<16x4xf32>
    %90 = arith.subf %89, %88 : vector<16x4xf32>
    %91 = vector.extract_strided_slice %86 {offsets = [0, 0], sizes = [16, 4], strides = [1, 1]} : vector<16x8xf32> to vector<16x4xf32>
    %92 = tpu.concatenate %90, %91 in 1 : vector<16x4xf32>, vector<16x4xf32> -> vector<16x8xf32>
    %93 = arith.mulf %92, %26 : vector<16x8xf32>
    %94 = arith.addf %87, %93 : vector<16x8xf32>
    %cst_35 = arith.constant 0.353553385 : f32
    %95 = vector.broadcast %cst_35 : f32 to vector<16x8xf32>
    %96 = arith.mulf %94, %95 : vector<16x8xf32>
    %c0_36 = arith.constant 0 : index
    %c8_37 = arith.constant 8 : index
    %97 = vector.load %arg16[%c0_36, %c8_37] : memref<16x16xbf16, #tpu.memory_space<vmem>>, vector<16x8xbf16>
    %c0_38 = arith.constant 0 : index
    %c8_39 = arith.constant 8 : index
    %98 = vector.load %arg17[%c0_38, %c8_39] : memref<16x16xbf16, #tpu.memory_space<vmem>>, vector<16x8xbf16>
    %99 = arith.truncf %96 : vector<16x8xf32> to vector<16x8xbf16>
    %cst_40 = arith.constant dense<0.000000e+00> : vector<16x16xf32>
    %100 = tpu.matmul %99, %97, %cst_40 {dimension_numbers = #tpu.dot_dimension_numbers<[1], [1], [0], [0], [0, 0, 1, 0], [], []>} : vector<16x8xbf16>, vector<16x8xbf16>, vector<16x16xf32> -> vector<16x16xf32>
    %cst_41 = arith.constant -1.000000e+30 : f32
    %101 = vector.broadcast %cst_41 : f32 to vector<16x16xf32>
    %102 = arith.select %48, %100, %101 : vector<16x16xi1>, vector<16x16xf32>
    %cst_42 = arith.constant dense<0xFF800000> : vector<16xf32>
    %103 = vector.multi_reduction <maximumf>, %102, %cst_42 [1] : vector<16x16xf32> to vector<16xf32>
    %104 = vector.shape_cast %103 : vector<16xf32> to vector<16x1xf32>
    %105 = vector.broadcast %104 : vector<16x1xf32> to vector<16x16xf32>
    %106 = arith.subf %102, %105 : vector<16x16xf32>
    %107 = math.exp %106 : vector<16x16xf32>
    %cst_43 = arith.constant dense<0.000000e+00> : vector<16xf32>
    %108 = vector.multi_reduction <add>, %107, %cst_43 [1] : vector<16x16xf32> to vector<16xf32>
    %109 = vector.shape_cast %108 : vector<16xf32> to vector<16x1xf32>
    %110 = arith.truncf %107 : vector<16x16xf32> to vector<16x16xbf16>
    %cst_44 = arith.constant dense<0.000000e+00> : vector<16x8xf32>
    %111 = tpu.matmul %110, %98, %cst_44 {dimension_numbers = #tpu.dot_dimension_numbers<[1], [0], [0], [1], [0, 0, 1, 1], [], []>} : vector<16x16xbf16>, vector<16x8xbf16>, vector<16x8xf32> -> vector<16x8xf32>
    %112 = tpu.reciprocal %109 {approx = true} : vector<16x1xf32> -> vector<16x1xf32>
    %113 = vector.broadcast %112 : vector<16x1xf32> to vector<16x8xf32>
    %114 = arith.mulf %111, %113 : vector<16x8xf32>
    %115 = vector.extract_strided_slice %114 {offsets = [0, 0], sizes = [8, 8], strides = [1, 1]} : vector<16x8xf32> to vector<8x8xf32>
    %c0_45 = arith.constant 0 : index
    %c16 = arith.constant 16 : index
    %116 = vector.load %arg18[%c0_45, %c16] : memref<8x32xf32, #tpu.memory_space<vmem>>, vector<8x8xf32>
    tpu.vector_store %arg18[%c0_45, %c16], %115 {strides = array<i32>} : memref<8x32xf32, #tpu.memory_space<vmem>>, vector<8x8xf32>,
    %117 = vector.extract_strided_slice %114 {offsets = [8, 0], sizes = [8, 8], strides = [1, 1]} : vector<16x8xf32> to vector<8x8xf32>
    %c0_46 = arith.constant 0 : index
    %c24 = arith.constant 24 : index
    %118 = vector.load %arg18[%c0_46, %c24] : memref<8x32xf32, #tpu.memory_space<vmem>>, vector<8x8xf32>
    tpu.vector_store %arg18[%c0_46, %c24], %117 {strides = array<i32>} : memref<8x32xf32, #tpu.memory_space<vmem>>, vector<8x8xf32>,
    %c0_47 = arith.constant 0 : index
    %c0_48 = arith.constant 0 : index
    %119 = vector.load %arg18[%c0_47, %c0_48] : memref<8x32xf32, #tpu.memory_space<vmem>>, vector<8x32xf32>
    %120 = arith.truncf %119 : vector<8x32xf32> to vector<8x32xbf16>
    %c0_49 = arith.constant 0 : index
    %c0_50 = arith.constant 0 : index
    %121 = vector.load %arg9[%c0_49, %c0_50] : memref<32x32xbf16, #tpu.memory_space<vmem>>, vector<32x32xbf16>
    %cst_51 = arith.constant dense<0.000000e+00> : vector<8x32xf32>
    %122 = tpu.matmul %120, %121, %cst_51 {dimension_numbers = #tpu.dot_dimension_numbers<[1], [0], [0], [1], [0, 0, 1, 1], [], []>} : vector<8x32xbf16>, vector<32x32xbf16>, vector<8x32xf32> -> vector<8x32xf32>
    %123 = arith.addf %6, %122 : vector<8x32xf32>
    %124 = arith.mulf %123, %123 : vector<8x32xf32>
    %cst_52 = arith.constant dense<0.000000e+00> : vector<8xf32>
    %125 = vector.multi_reduction <add>, %124, %cst_52 [1] : vector<8x32xf32> to vector<8xf32>
    %126 = vector.shape_cast %125 : vector<8xf32> to vector<8x1xf32>
    %cst_53 = arith.constant 3.200000e+01 : f32
    %127 = vector.broadcast %cst_53 : f32 to vector<8x1xf32>
    %128 = arith.divf %126, %127 : vector<8x1xf32>
    %cst_54 = arith.constant 9.99999997E-7 : f32
    %129 = vector.broadcast %cst_54 : f32 to vector<8x1xf32>
    %130 = arith.addf %128, %129 : vector<8x1xf32>
    %131 = math.rsqrt %130 : vector<8x1xf32>
    %132 = vector.broadcast %131 : vector<8x1xf32> to vector<8x32xf32>
    %133 = arith.mulf %123, %132 : vector<8x32xf32>
    %c0_55 = arith.constant 0 : index
    %c0_56 = arith.constant 0 : index
    %134 = vector.load %arg14[%c0_55, %c0_56] : memref<1x32xf32, #tpu.memory_space<vmem>>, vector<1x32xf32>
    %135 = vector.broadcast %134 : vector<1x32xf32> to vector<8x32xf32>
    %136 = arith.mulf %133, %135 : vector<8x32xf32>
    %137 = arith.truncf %136 : vector<8x32xf32> to vector<8x32xbf16>
    %c0_57 = arith.constant 0 : index
    %c0_58 = arith.constant 0 : index
    %138 = vector.load %arg10[%c0_57, %c0_58] : memref<32x64xbf16, #tpu.memory_space<vmem>>, vector<32x64xbf16>
    %cst_59 = arith.constant dense<0.000000e+00> : vector<8x64xf32>
    %139 = tpu.matmul %137, %138, %cst_59 {dimension_numbers = #tpu.dot_dimension_numbers<[1], [0], [0], [1], [0, 0, 1, 1], [], []>} : vector<8x32xbf16>, vector<32x64xbf16>, vector<8x64xf32> -> vector<8x64xf32>
    %c0_60 = arith.constant 0 : index
    %c0_61 = arith.constant 0 : index
    %140 = vector.load %arg11[%c0_60, %c0_61] : memref<32x64xbf16, #tpu.memory_space<vmem>>, vector<32x64xbf16>
    %cst_62 = arith.constant dense<0.000000e+00> : vector<8x64xf32>
    %141 = tpu.matmul %137, %140, %cst_62 {dimension_numbers = #tpu.dot_dimension_numbers<[1], [0], [0], [1], [0, 0, 1, 1], [], []>} : vector<8x32xbf16>, vector<32x64xbf16>, vector<8x64xf32> -> vector<8x64xf32>
    %142 = arith.negf %139 : vector<8x64xf32>
    %143 = math.exp %142 : vector<8x64xf32>
    %cst_63 = arith.constant 1.000000e+00 : f32
    %144 = vector.broadcast %cst_63 : f32 to vector<8x64xf32>
    %145 = arith.addf %144, %143 : vector<8x64xf32>
    %146 = arith.divf %144, %145 : vector<8x64xf32>
    %147 = arith.mulf %139, %146 : vector<8x64xf32>
    %148 = arith.mulf %147, %141 : vector<8x64xf32>
    %149 = arith.truncf %148 : vector<8x64xf32> to vector<8x64xbf16>
    %c0_64 = arith.constant 0 : index
    %c0_65 = arith.constant 0 : index
    %150 = vector.load %arg12[%c0_64, %c0_65] : memref<64x32xbf16, #tpu.memory_space<vmem>>, vector<64x32xbf16>
    %cst_66 = arith.constant dense<0.000000e+00> : vector<8x32xf32>
    %151 = tpu.matmul %149, %150, %cst_66 {dimension_numbers = #tpu.dot_dimension_numbers<[1], [0], [0], [1], [0, 0, 1, 1], [], []>} : vector<8x64xbf16>, vector<64x32xbf16>, vector<8x32xf32> -> vector<8x32xf32>
    %152 = arith.addf %123, %151 : vector<8x32xf32>
    %c0_67 = arith.constant 0 : index
    %c0_68 = arith.constant 0 : index
    %c0_69 = arith.constant 0 : index
    %153 = vector.load %arg15[%c0_67, %c0_68, %c0_69] : memref<1x8x32xf32, #tpu.memory_space<vmem>>, vector<1x8x32xf32>
    %154 = vector.shape_cast %153 : vector<1x8x32xf32> to vector<8x32xf32>
    %155 = vector.shape_cast %152 : vector<8x32xf32> to vector<1x8x32xf32>
    tpu.vector_store %arg15[%c0_67, %c0_68, %c0_69], %155 {strides = array<i32>} : memref<1x8x32xf32, #tpu.memory_space<vmem>>, vector<1x8x32xf32>,
    return
  }
  func.func @transform_0(%arg0: i32, %arg1: i32) -> (i32, i32, i32) {
    %c0_i32 = arith.constant 0 : i32
    %c0_i32_0 = arith.constant 0 : i32
    %c0_i32_1 = arith.constant 0 : i32
    return %arg0, %c0_i32, %c0_i32_0 : i32, i32, i32
  }
  func.func @transform_1(%arg0: i32, %arg1: i32) -> (i32, i32, i32) {
    %c0_i32 = arith.constant 0 : i32
    %c0_i32_0 = arith.constant 0 : i32
    return %arg0, %arg1, %c0_i32 : i32, i32, i32
  }
  func.func @transform_2(%arg0: i32, %arg1: i32) -> (i32, i32, i32) {
    %c0_i32 = arith.constant 0 : i32
    %c0_i32_0 = arith.constant 0 : i32
    %c0_i32_1 = arith.constant 0 : i32
    %c0_i32_2 = arith.constant 0 : i32
    return %c0_i32, %c0_i32_0, %c0_i32_1 : i32, i32, i32
  }
  func.func @transform_3(%arg0: i32, %arg1: i32) -> (i32, i32, i32) {
    %c0_i32 = arith.constant 0 : i32
    %c0_i32_0 = arith.constant 0 : i32
    %c0_i32_1 = arith.constant 0 : i32
    return %c0_i32, %arg1, %c0_i32_0 : i32, i32, i32
  }
  func.func @transform_4(%arg0: i32, %arg1: i32) -> (i32, i32) {
    %c0_i32 = arith.constant 0 : i32
    %c0_i32_0 = arith.constant 0 : i32
    %c0_i32_1 = arith.constant 0 : i32
    return %c0_i32, %c0_i32_0 : i32, i32
  }
  func.func @transform_5(%arg0: i32, %arg1: i32) -> (i32, i32) {
    %c0_i32 = arith.constant 0 : i32
    %c0_i32_0 = arith.constant 0 : i32
    %c0_i32_1 = arith.constant 0 : i32
    return %c0_i32, %c0_i32_0 : i32, i32
  }
  func.func @transform_6(%arg0: i32, %arg1: i32) -> (i32, i32) {
    %c0_i32 = arith.constant 0 : i32
    %c0_i32_0 = arith.constant 0 : i32
    %c0_i32_1 = arith.constant 0 : i32
    return %c0_i32, %c0_i32_0 : i32, i32
  }
  func.func @transform_7(%arg0: i32, %arg1: i32) -> (i32, i32) {
    %c0_i32 = arith.constant 0 : i32
    %c0_i32_0 = arith.constant 0 : i32
    %c0_i32_1 = arith.constant 0 : i32
    return %c0_i32, %c0_i32_0 : i32, i32
  }
  func.func @transform_8(%arg0: i32, %arg1: i32) -> (i32, i32) {
    %c0_i32 = arith.constant 0 : i32
    %c0_i32_0 = arith.constant 0 : i32
    %c0_i32_1 = arith.constant 0 : i32
    return %c0_i32, %c0_i32_0 : i32, i32
  }
  func.func @transform_9(%arg0: i32, %arg1: i32) -> (i32, i32) {
    %c0_i32 = arith.constant 0 : i32
    %c0_i32_0 = arith.constant 0 : i32
    %c0_i32_1 = arith.constant 0 : i32
    return %c0_i32, %c0_i32_0 : i32, i32
  }
  func.func @transform_10(%arg0: i32, %arg1: i32) -> (i32, i32) {
    %c0_i32 = arith.constant 0 : i32
    %c0_i32_0 = arith.constant 0 : i32
    %c0_i32_1 = arith.constant 0 : i32
    return %c0_i32, %c0_i32_0 : i32, i32
  }
  func.func @transform_11(%arg0: i32, %arg1: i32) -> (i32, i32) {
    %c0_i32 = arith.constant 0 : i32
    %c0_i32_0 = arith.constant 0 : i32
    %c0_i32_1 = arith.constant 0 : i32
    return %c0_i32, %c0_i32_0 : i32, i32
  }
  func.func @transform_12(%arg0: i32, %arg1: i32) -> (i32, i32) {
    %c0_i32 = arith.constant 0 : i32
    %c0_i32_0 = arith.constant 0 : i32
    %c0_i32_1 = arith.constant 0 : i32
    return %c0_i32, %c0_i32_0 : i32, i32
  }
  func.func @transform_13(%arg0: i32, %arg1: i32) -> (i32, i32, i32) {
    %c0_i32 = arith.constant 0 : i32
    %c0_i32_0 = arith.constant 0 : i32
    return %arg0, %arg1, %c0_i32 : i32, i32, i32
  }
}

</mosaic_0001>

<bundles_post_ra>
// kernel: tpu_custom_call.1
= control target key start
LH: loop header
LB: loop body
LE: loop exit
PB: predicated region body
PF: predicated region fallthrough
CT: control target
= control target key end

     0   :  { %s3874_s0 = inlined_call_operand.hbm [shape: f32[2,16,32], index: 0, kind: input, shape index: {}]   ;;  %s3875_s1 = inlined_call_operand.hbm [shape: f32[2,16,32], index: 1, kind: input, shape index: {}]   ;;  %s3876_s2 = inlined_call_operand.hbm [shape: f32[2,16,8], index: 2, kind: input, shape index: {}]   ;;  %s3877_s3 = inlined_call_operand.hbm [shape: f32[2,16,8], index: 3, kind: input, shape index: {}]   ;;  %s3878_s4 = inlined_call_operand.hbm [shape: bf16[32,32], index: 4, kind: input, shape index: {}]   ;;  %s3879_s5 = inlined_call_operand.hbm [shape: bf16[32,16], index: 5, kind: input, shape index: {}]   ;;  %s3880_s6 = inlined_call_operand.hbm [shape: bf16[32,16], index: 6, kind: input, shape index: {}]   ;;  %s3881_s7 = inlined_call_operand.hbm [shape: bf16[32,32], index: 7, kind: input, shape index: {}]   ;;  %s3882_s8 = inlined_call_operand.hbm [shape: bf16[32,64], index: 8, kind: input, shape index: {}]   ;;  %s3883_s9 = inlined_call_operand.hbm [shape: bf16[32,64], index: 9, kind: input, shape index: {}]   ;;  %s3884_s10 = inlined_call_operand.hbm [shape: bf16[64,32], index: 10, kind: input, shape index: {}]   ;;  %s3885_s11 = inlined_call_operand.hbm [shape: f32[1,32], index: 11, kind: input, shape index: {}]   ;;  %s3886_s12 = inlined_call_operand.hbm [shape: f32[1,32], index: 12, kind: input, shape index: {}]   ;;  %s3887_s13 = inlined_call_operand.hbm [shape: f32[2,16,32], index: 13, kind: output, shape index: {}]  }
   0x1   :  { %3920 = sst [smem:[#allocation53_spill]] %s3874_s0 }
   0x2   :  { %3921 = sst [smem:[#allocation54_spill]] %s3875_s1 }
   0x3   :  { %3922 = sst [smem:[#allocation55_spill]] %s3876_s2 }
   0x4   :  { %3923 = sst [smem:[#allocation56_spill]] %s3877_s3 }
   0x5   :  { %3924 = sst [smem:[#allocation57_spill]] %s3878_s4 }
   0x6   :  { %3925 = sst [smem:[#allocation58_spill]] %s3879_s5 }
   0x7   :  { %3926 = sst [smem:[#allocation59_spill]] %s3880_s6 }
   0x8   :  { %3927 = sst [smem:[#allocation60_spill]] %s3881_s7 }
   0x9   :  { %3928 = sst [smem:[#allocation61_spill]] %s3882_s8 }
   0xa   :  { %3929 = sst [smem:[#allocation62_spill]] %s3883_s9 }
   0xb   :  { %3930 = sst [smem:[#allocation63_spill]] %s3884_s10 }
   0xc   :  { %3931 = sst [smem:[#allocation64_spill]] %s3885_s11 }
   0xd   :  { %3932 = sst [smem:[#allocation65_spill]] %s3886_s12 }
   0xe   :  { %3933 = sst [smem:[#allocation66_spill]] %s3887_s13 }
   0xf   :  { %18 = vsyncpa [#allocation6], 0 }
  0x10   :  { %20 = vsyncpa [#allocation6 + $0x1], 0 }
  0x11   :  { %21 = vsyncpa [#allocation9], 0 }
  0x12   :  { %23 = vsyncpa [#allocation9 + $0x1], 0 }
  0x13   :  { %24 = vsyncpa [#allocation12], 0 }
  0x14   :  { %26 = vsyncpa [#allocation12 + $0x1], 0 }
  0x15   :  { %27 = vsyncpa [#allocation15], 0 }
  0x16   :  { %28 = vsyncpa [#allocation18], 0 }
  0x17   :  { %29 = vsyncpa [#allocation21], 0 }
  0x18   :  { %30 = vsyncpa [#allocation24], 0 }
  0x19   :  { %31 = vsyncpa [#allocation7], 0 }
  0x1a   :  { %33 = vsyncpa [#allocation7 + $0x1], 0  ;;  %s3043_s25 = smov 0   ;;  %s3045_s26 = smov 0  }
  0x1b   :  { %s3047_s27 = smov 0   ;;  %s3049_s28 = smov 0  }
  0x1c   :  { %s3051_s29 = smov 0   ;;  %s3053_s30 = smov 0  }
  0x1d   :  { %s3055_s14 = smov 0   ;;  %s3057_s15 = smov 0  }
  0x1e   :  { %s3059_s16 = smov 0   ;;  %s3061_s17 = smov 0  }
  0x1f   :  { %s3063_s18 = smov 0   ;;  %s3065_s19 = smov 0  }
  0x20   :  { %s3067_s20 = smov 0   ;;  %s3069_s21 = smov 0  }
  0x21 LB: > { %3934 = sst [smem:[#allocation37_spill]] %s2883_s25  ;;  %s3114_s22 = sadd.s32 4294967295, %s2935_s21   ;;  %s2935_s21 = sphi %s3069_s21, %s39_s21   ;;  %s2931_s20 = sphi %s3067_s20, %s4035_s20   ;;  %s2927_s19 = sphi %s3065_s19, %s4040_s19   ;;  %s2923_s18 = sphi %s3063_s18, %s4033_s18   ;;  %s2919_s17 = sphi %s3061_s17, %s4032_s17   ;;  %s2915_s16 = sphi %s3059_s16, %s4031_s16   ;;  %s2911_s15 = sphi %s3057_s15, %s4039_s15   ;;  %s2907_s14 = sphi %s3055_s14, %s4038_s14   ;;  %s2903_s30 = sphi %s3053_s30, %s4029_s30   ;;  %s2899_s29 = sphi %s3051_s29, %s4028_s29   ;;  %s2895_s28 = sphi %s3049_s28, %s4027_s28   ;;  %s2891_s27 = sphi %s3047_s27, %s4037_s27   ;;  %s2887_s26 = sphi %s3045_s26, %s4026_s26   ;;  %s2883_s25 = sphi %s3043_s25, %s4025_s25  }
  0x22   : > { %3935 = sst [smem:[#allocation38_spill]] %s2887_s26  ;;  %p1896_p0 = scmp.ge.s32.totalorder %s2935_s21, 1 }
  0x23   : > { %3936 = sst [smem:[#allocation39_spill]] %s2891_s27  ;;  %p3897_p1 = scmp.eq.s32.totalorder %s3114_s22, 0 }
  0x24   : > { %3937 = sst [smem:[#allocation40_spill]] %s2895_s28  ;;  %p374_p2 = scmp.lt.s32.totalorder %s2935_s21, 5 }
  0x25   : > { %3938 = sst [smem:[#allocation41_spill]] %s2899_s29  ;;  %s2937_s24 = smov [#allocation10]  }
  0x26   : > { %3939 = sst [smem:[#allocation42_spill]] %s2903_s30  ;;  %p3119_p3 = pnand %p1896_p0, %p374_p2 }
  0x27   : > { %3940 = sst [smem:[#allocation43_spill]] %s2915_s16  ;;  %s386_s13 = sshll.u32 %s2937_s24, 4  ;;  %s387_s13 = int_to_ptr.vmem [resolvable:$true] %s386_s13 }
  0x28   : > { %3941 = sst [smem:[#allocation44_spill]] %s2919_s17  ;;  %p2132_p4 = pneg %p3119_p3 }
  0x29   : > { %3942 = sst [smem:[#allocation45_spill]] %s2923_s18  ;;  %s2938_s17 = smov [#allocation13]  }
  0x2a   : > { %3943 = sst [smem:[#allocation46_spill]] %s2927_s19  ;;  %p3127_p5 = pnand %p2132_p4, %p3897_p1 }
  0x2b   : > { %3944 = sst [smem:[#allocation47_spill]] %s2931_s20  ;;  %s399_s3 = sshll.u32 %s2938_s17, 4  ;;  %s3131_s3 = int_to_ptr.vmem [resolvable:$true] %s399_s3 }
  0x2c   : > { %s3945_s23 = scalar_select %p3119_p3, 1, 0 }
  0x2d   : > { %s3948_s2 = sld [smem:[#allocation55_spill]]  ;;  %p3141_p7 = pneg %p3127_p5 }
  0x2e   : > { %3946 = sst [smem:[#allocation48_spill]] %s3945_s23 }
  0x33   : > { %s2387_s26 = scalar_lea.hbm %s3948_s2, 512 }
  0x34   : > { %p2388_p6 = scmp.ne.s32.totalorder %s3948_s2, %s2387_s26  ;;  %p2394_p10 = scmp.lt.u32.totalorder %s2387_s26, %s3948_s2 }
  0x36   : > { %p2390_p8 = pnand %p3141_p7, %p2388_p6 }
  0x38   : > { %p2391_p9 = pneg %p2390_p8 }
  0x3a   : > { %p2396_p11 = pnand %p2394_p10, %p2391_p9 }
  0x3c   : > { %2399 = shalt.err (!%p2396_p11)
}
  0x3d   : > { %s2400_s1 = scalar_lea.vmem %s387_s13, 512  ;;  %p2408_p2 = scmp.lt.s32.totalorder %s387_s13, %s387_s13 }
  0x3e   : > { %p2401_p12 = scmp.ne.s32.totalorder %s387_s13, %s2400_s1  ;;  %p2409_p4 = scmp.lt.s32.totalorder %s2400_s1, %s2400_s1 }
  0x40   : > { %p2403_p13 = pnand %p2401_p12, %p3141_p7  ;;  %p2410_p1 = por %p2409_p4, %p2408_p2 }
  0x42   : > { %p2404_p0 = pneg %p2403_p13 }
  0x44   : > { %p2411_p3 = pnand %p2410_p1, %p2404_p0 }
  0x46   : > { %2414 = shalt.err (!%p2411_p3)
}
  0x47   : > { %s3904_s25 = smov 128   ;;  %s3906_s27 = smov 8  }
  0x48   : > { %2135 = dma.hbm_to_vmem [thread:$0]  (!%p3127_p5), %s3948_s2, 512, %s387_s13, [#allocation9], %s3904_s25, %s3904_s25, %s3906_s27  }
  0x49   : > { %s3950_s4 = sld [smem:[#allocation57_spill]] }
  0x4f   : > { %s2415_s29 = scalar_lea.hbm %s3950_s4, 256 }
  0x50   : > { %p2416_p1 = scmp.ne.s32.totalorder %s3950_s4, %s2415_s29  ;;  %p2422_p8 = scmp.lt.u32.totalorder %s2415_s29, %s3950_s4 }
  0x52   : > { %p2418_p3 = pnand %p2416_p1, %p3141_p7 }
  0x54   : > { %p2419_p6 = pneg %p2418_p3 }
  0x56   : > { %p2424_p9 = pnand %p2422_p8, %p2419_p6 }
  0x58   : > { %2427 = shalt.err (!%p2424_p9)
}
  0x59   : > { %s2428_s13 = scalar_lea.vmem %s3131_s3, 256  ;;  %p2436_p13 = scmp.lt.s32.totalorder %s3131_s3, %s3131_s3 }
  0x5a   : > { %p2429_p10 = scmp.ne.s32.totalorder %s3131_s3, %s2428_s13  ;;  %p2437_p0 = scmp.lt.s32.totalorder %s2428_s13, %s2428_s13 }
  0x5c   : > { %p2431_p11 = pnand %p2429_p10, %p3141_p7  ;;  %p2438_p2 = por %p2437_p0, %p2436_p13 }
  0x5e   : > { %p2432_p12 = pneg %p2431_p11 }
  0x60   : > { %p2439_p4 = pnand %p2438_p2, %p2432_p12 }
  0x62   : > { %2442 = shalt.err (!%p2439_p4)
}
  0x63   : > { %s2941_s30 = smov 64   ;;  %s2942_s0 = smov 4  }
  0x64   : > { %2138 = dma.hbm_to_vmem [thread:$0]  (!%p3127_p5), %s3950_s4, 256, %s3131_s3, [#allocation12], %s2941_s30, %s2941_s30, %s2942_s0  }
  0x65   : > { %s2943_s26 = smov [#allocation14]   ;;  %s2944_s23 = smov [#allocation17]  }
  0x66   : > { %s412_s28 = sshll.u32 %s2943_s26, 4  ;;  %s438_s17 = sshll.u32 %s2944_s23, 4  ;;  %s413_s28 = int_to_ptr.vmem [resolvable:$true] %s412_s28  ;;  %s3186_s17 = int_to_ptr.vmem [resolvable:$true] %s438_s17 }
  0x67   : > { %s3951_s5 = sld [smem:[#allocation58_spill]] }
  0x6d   : > { %s2443_s25 = scalar_lea.hbm %s3951_s5, 256 }
  0x6e   : > { %p2444_p1 = scmp.ne.s32.totalorder %s3951_s5, %s2443_s25  ;;  %p2450_p8 = scmp.lt.u32.totalorder %s2443_s25, %s3951_s5 }
  0x70   : > { %p2446_p3 = pnand %p2444_p1, %p3141_p7 }
  0x72   : > { %p2447_p6 = pneg %p2446_p3 }
  0x74   : > { %p2452_p9 = pnand %p2450_p8, %p2447_p6 }
  0x76   : > { %2455 = shalt.err (!%p2452_p9)
}
  0x77   : > { %s2456_s19 = scalar_lea.vmem %s413_s28, 256  ;;  %p2464_p13 = scmp.lt.s32.totalorder %s413_s28, %s413_s28 }
  0x78   : > { %p2457_p10 = scmp.ne.s32.totalorder %s413_s28, %s2456_s19  ;;  %p2465_p0 = scmp.lt.s32.totalorder %s2456_s19, %s2456_s19 }
  0x7a   : > { %p2459_p11 = pnand %p2457_p10, %p3141_p7  ;;  %p2466_p2 = por %p2465_p0, %p2464_p13 }
  0x7c   : > { %p2460_p12 = pneg %p2459_p11 }
  0x7e   : > { %p2467_p4 = pnand %p2466_p2, %p2460_p12 }
  0x80   : > { %2470 = shalt.err (!%p2467_p4)
}
  0x81   : > { %2141 = dma.hbm_to_vmem [thread:$0]  (!%p3127_p5), %s3951_s5, 256, %s413_s28, [#allocation15], %s2941_s30, %s2941_s30, %s2942_s0  }
  0x82   : > { %s3952_s7 = sld [smem:[#allocation60_spill]] }
  0x88   : > { %s2471_s23 = scalar_lea.hbm %s3952_s7, 256 }
  0x89   : > { %p2472_p1 = scmp.ne.s32.totalorder %s3952_s7, %s2471_s23  ;;  %p2478_p8 = scmp.lt.u32.totalorder %s2471_s23, %s3952_s7 }
  0x8b   : > { %p2474_p3 = pnand %p2472_p1, %p3141_p7 }
  0x8d   : > { %p2475_p6 = pneg %p2474_p3 }
  0x8f   : > { %p2480_p9 = pnand %p2478_p8, %p2475_p6 }
  0x91   : > { %2483 = shalt.err (!%p2480_p9)
}
  0x92   : > { %s2484_s28 = scalar_lea.vmem %s3186_s17, 256  ;;  %p2492_p13 = scmp.lt.s32.totalorder %s3186_s17, %s3186_s17 }
  0x93   : > { %p2485_p10 = scmp.ne.s32.totalorder %s3186_s17, %s2484_s28  ;;  %p2493_p0 = scmp.lt.s32.totalorder %s2484_s28, %s2484_s28 }
  0x95   : > { %p2487_p11 = pnand %p2485_p10, %p3141_p7  ;;  %p2494_p2 = por %p2493_p0, %p2492_p13 }
  0x97   : > { %p2488_p12 = pneg %p2487_p11 }
  0x99   : > { %p2495_p4 = pnand %p2494_p2, %p2488_p12 }
  0x9b   : > { %2498 = shalt.err (!%p2495_p4)
}
  0x9c   : > { %2147 = dma.hbm_to_vmem [thread:$0]  (!%p3127_p5), %s3952_s7, 256, %s3186_s17, [#allocation18], %s2941_s30, %s2941_s30, %s2942_s0  }
  0x9d   : > { %s2945_s25 = smov [#allocation20]   ;;  %s2946_s26 = smov [#allocation23]  }
  0x9e   : > { %s464_s27 = sshll.u32 %s2945_s25, 4  ;;  %s491_s23 = sshll.u32 %s2946_s26, 4  ;;  %s465_s27 = int_to_ptr.vmem [resolvable:$true] %s464_s27  ;;  %s3235_s23 = int_to_ptr.vmem [resolvable:$true] %s491_s23 }
  0x9f   : > { %s3953_s9 = sld [smem:[#allocation62_spill]] }
  0xa5   : > { %s2499_s29 = scalar_lea.hbm %s3953_s9, 256 }
  0xa6   : > { %p2500_p1 = scmp.ne.s32.totalorder %s3953_s9, %s2499_s29  ;;  %p2506_p8 = scmp.lt.u32.totalorder %s2499_s29, %s3953_s9 }
  0xa8   : > { %p2502_p3 = pnand %p2500_p1, %p3141_p7 }
  0xaa   : > { %p2503_p6 = pneg %p2502_p3 }
  0xac   : > { %p2508_p9 = pnand %p2506_p8, %p2503_p6 }
  0xae   : > { %2511 = shalt.err (!%p2508_p9)
}
  0xaf   : > { %s2512_s2 = scalar_lea.vmem %s465_s27, 256  ;;  %p2520_p13 = scmp.lt.s32.totalorder %s465_s27, %s465_s27 }
  0xb0   : > { %p2513_p10 = scmp.ne.s32.totalorder %s465_s27, %s2512_s2  ;;  %p2521_p0 = scmp.lt.s32.totalorder %s2512_s2, %s2512_s2 }
  0xb2   : > { %p2515_p11 = pnand %p2513_p10, %p3141_p7  ;;  %p2522_p2 = por %p2521_p0, %p2520_p13 }
  0xb4   : > { %p2516_p12 = pneg %p2515_p11 }
  0xb6   : > { %p2523_p4 = pnand %p2522_p2, %p2516_p12 }
  0xb8   : > { %2526 = shalt.err (!%p2523_p4)
}
  0xb9   : > { %2153 = dma.hbm_to_vmem [thread:$0]  (!%p3127_p5), %s3953_s9, 256, %s465_s27, [#allocation21], %s2941_s30, %s2941_s30, %s2942_s0  }
  0xba   : > { %s3954_s11 = sld [smem:[#allocation64_spill]] }
  0xc0   : > { %s2527_s29 = scalar_lea.hbm %s3954_s11, 16 }
  0xc1   : > { %p2528_p1 = scmp.ne.s32.totalorder %s3954_s11, %s2527_s29  ;;  %p2534_p8 = scmp.lt.u32.totalorder %s2527_s29, %s3954_s11 }
  0xc3   : > { %p2530_p3 = pnand %p2528_p1, %p3141_p7 }
  0xc5   : > { %p2531_p6 = pneg %p2530_p3 }
  0xc7   : > { %p2536_p9 = pnand %p2534_p8, %p2531_p6 }
  0xc9   : > { %2539 = shalt.err (!%p2536_p9)
}
  0xca   : > { %s2540_s27 = scalar_lea.vmem %s3235_s23, 16  ;;  %s2547_s2 = scalar_lea.vmem %s3235_s23, 32 }
  0xcb   : > { %p2541_p10 = scmp.ne.s32.totalorder %s3235_s23, %s2540_s27  ;;  %p2548_p13 = scmp.lt.s32.totalorder %s3235_s23, %s3235_s23 }
  0xcc   : > { %p2549_p0 = scmp.lt.s32.totalorder %s2547_s2, %s2540_s27 }
  0xcd   : > { %p2543_p11 = pnand %p2541_p10, %p3141_p7 }
  0xce   : > { %p2550_p2 = por %p2549_p0, %p2548_p13 }
  0xcf   : > { %p2544_p12 = pneg %p2543_p11 }
  0xd1   : > { %p2551_p4 = pnand %p2550_p2, %p2544_p12 }
  0xd3   : > { %2554 = shalt.err (!%p2551_p4)
}
  0xd4   : > { %2159 = dma.hbm_to_vmem [thread:$0]  (!%p3127_p5), %s3954_s11, 16, %s3235_s23, [#allocation24]  }
  0xd5   : > { %s2947_s1 = smov [#allocation16]   ;;  %s2948_s29 = smov [#allocation19]  }
  0xd6   : > { %s425_s13 = sshll.u32 %s2947_s1, 4  ;;  %s451_s3 = sshll.u32 %s2948_s29, 4  ;;  %s426_s13 = int_to_ptr.vmem [resolvable:$true] %s425_s13  ;;  %s3282_s3 = int_to_ptr.vmem [resolvable:$true] %s451_s3 }
  0xd7   : > { %s3955_s6 = sld [smem:[#allocation59_spill]] }
  0xdd   : > { %s2555_s17 = scalar_lea.hbm %s3955_s6, 256 }
  0xde   : > { %p2556_p1 = scmp.ne.s32.totalorder %s3955_s6, %s2555_s17  ;;  %p2562_p8 = scmp.lt.u32.totalorder %s2555_s17, %s3955_s6 }
  0xe0   : > { %p2558_p3 = pnand %p2556_p1, %p3141_p7 }
  0xe2   : > { %p2559_p6 = pneg %p2558_p3 }
  0xe4   : > { %p2564_p9 = pnand %p2562_p8, %p2559_p6 }
  0xe6   : > { %2567 = shalt.err (!%p2564_p9)
}
  0xe7   : > { %s2568_s26 = scalar_lea.vmem %s426_s13, 256  ;;  %p2576_p13 = scmp.lt.s32.totalorder %s426_s13, %s426_s13 }
  0xe8   : > { %p2569_p10 = scmp.ne.s32.totalorder %s426_s13, %s2568_s26  ;;  %p2577_p0 = scmp.lt.s32.totalorder %s2568_s26, %s2568_s26 }
  0xea   : > { %p2571_p11 = pnand %p2569_p10, %p3141_p7  ;;  %p2578_p2 = por %p2577_p0, %p2576_p13 }
  0xec   : > { %p2572_p12 = pneg %p2571_p11 }
  0xee   : > { %p2579_p4 = pnand %p2578_p2, %p2572_p12 }
  0xf0   : > { %2582 = shalt.err (!%p2579_p4)
}
  0xf1   : > { %2144 = dma.hbm_to_vmem [thread:$0]  (!%p3127_p5), %s3955_s6, 256, %s426_s13, [#allocation15], %s2941_s30, %s2941_s30, %s2942_s0  }
  0xf2   : > { %s3956_s8 = sld [smem:[#allocation61_spill]] }
  0xf8   : > { %s2583_s17 = scalar_lea.hbm %s3956_s8, 256 }
  0xf9   : > { %p2584_p1 = scmp.ne.s32.totalorder %s3956_s8, %s2583_s17  ;;  %p2590_p8 = scmp.lt.u32.totalorder %s2583_s17, %s3956_s8 }
  0xfb   : > { %p2586_p3 = pnand %p2584_p1, %p3141_p7 }
  0xfd   : > { %p2587_p6 = pneg %p2586_p3 }
  0xff   : > { %p2592_p9 = pnand %p2590_p8, %p2587_p6 }
 0x101   : > { %2595 = shalt.err (!%p2592_p9)
}
 0x102   : > { %s2596_s13 = scalar_lea.vmem %s3282_s3, 256  ;;  %p2604_p13 = scmp.lt.s32.totalorder %s3282_s3, %s3282_s3 }
 0x103   : > { %p2597_p10 = scmp.ne.s32.totalorder %s3282_s3, %s2596_s13  ;;  %p2605_p0 = scmp.lt.s32.totalorder %s2596_s13, %s2596_s13 }
 0x105   : > { %p2599_p11 = pnand %p2597_p10, %p3141_p7  ;;  %p2606_p2 = por %p2605_p0, %p2604_p13 }
 0x107   : > { %p2600_p12 = pneg %p2599_p11 }
 0x109   : > { %p2607_p4 = pnand %p2606_p2, %p2600_p12 }
 0x10b   : > { %2610 = shalt.err (!%p2607_p4)
}
 0x10c   : > { %2150 = dma.hbm_to_vmem [thread:$0]  (!%p3127_p5), %s3956_s8, 256, %s3282_s3, [#allocation18], %s2941_s30, %s2941_s30, %s2942_s0  }
 0x10d   : > { %s2949_s29 = smov [#allocation22]   ;;  %s2950_s19 = smov [#allocation25]  }
 0x10e   : > { %s477_s28 = sshll.u32 %s2949_s29, 4  ;;  %s502_s17 = sshll.u32 %s2950_s19, 4  ;;  %s478_s28 = int_to_ptr.vmem [resolvable:$true] %s477_s28  ;;  %s3331_s17 = int_to_ptr.vmem [resolvable:$true] %s502_s17 }
 0x10f   : > { %s3957_s10 = sld [smem:[#allocation63_spill]] }
 0x115   : > { %s2611_s25 = scalar_lea.hbm %s3957_s10, 512 }
 0x116   : > { %p2612_p1 = scmp.ne.s32.totalorder %s3957_s10, %s2611_s25  ;;  %p2618_p8 = scmp.lt.u32.totalorder %s2611_s25, %s3957_s10 }
 0x118   : > { %p2614_p3 = pnand %p2612_p1, %p3141_p7 }
 0x11a   : > { %p2615_p6 = pneg %p2614_p3 }
 0x11c   : > { %p2620_p9 = pnand %p2618_p8, %p2615_p6 }
 0x11e   : > { %2623 = shalt.err (!%p2620_p9)
}
 0x11f   : > { %s2624_s1 = scalar_lea.vmem %s478_s28, 512  ;;  %p2632_p13 = scmp.lt.s32.totalorder %s478_s28, %s478_s28 }
 0x120   : > { %p2625_p10 = scmp.ne.s32.totalorder %s478_s28, %s2624_s1  ;;  %p2633_p0 = scmp.lt.s32.totalorder %s2624_s1, %s2624_s1 }
 0x122   : > { %p2627_p11 = pnand %p2625_p10, %p3141_p7  ;;  %p2634_p2 = por %p2633_p0, %p2632_p13 }
 0x124   : > { %p2628_p12 = pneg %p2627_p11 }
 0x126   : > { %p2635_p4 = pnand %p2634_p2, %p2628_p12 }
 0x128   : > { %2638 = shalt.err (!%p2635_p4)
}
 0x129   : > { %2156 = dma.hbm_to_vmem [thread:$0]  (!%p3127_p5), %s3957_s10, 512, %s478_s28, [#allocation21], %s2941_s30, %s2941_s30, %s2942_s0  }
 0x12a   : > { %s3958_s12 = sld [smem:[#allocation65_spill]] }
 0x130   : > { %s2639_s25 = scalar_lea.hbm %s3958_s12, 16 }
 0x131   : > { %p2640_p1 = scmp.ne.s32.totalorder %s3958_s12, %s2639_s25  ;;  %p2646_p8 = scmp.lt.u32.totalorder %s2639_s25, %s3958_s12 }
 0x133   : > { %p2642_p3 = pnand %p2640_p1, %p3141_p7 }
 0x135   : > { %p2643_p6 = pneg %p2642_p3 }
 0x137   : > { %p2648_p9 = pnand %p2646_p8, %p2643_p6 }
 0x139   : > { %2651 = shalt.err (!%p2648_p9)
}
 0x13a   : > { %s2652_s30 = scalar_lea.vmem %s3331_s17, 16  ;;  %s2659_s0 = scalar_lea.vmem %s3331_s17, 32 }
 0x13b   : > { %p2653_p10 = scmp.ne.s32.totalorder %s3331_s17, %s2652_s30  ;;  %p2660_p13 = scmp.lt.s32.totalorder %s3331_s17, %s3331_s17 }
 0x13c   : > { %p2661_p0 = scmp.lt.s32.totalorder %s2659_s0, %s2652_s30 }
 0x13d   : > { %p2655_p11 = pnand %p2653_p10, %p3141_p7 }
 0x13e   : > { %p2662_p2 = por %p2661_p0, %p2660_p13 }
 0x13f   : > { %p2656_p12 = pneg %p2655_p11 }
 0x141   : > { %p2663_p4 = pnand %p2662_p2, %p2656_p12 }
 0x143   : > { %2666 = shalt.err (!%p2663_p4)
}
 0x144   : > { %2162 = dma.hbm_to_vmem [thread:$0]  (!%p3127_p5), %s3958_s12, 16, %s3331_s17, [#allocation24]  }
 0x145   : > { %s51_s24 = sadd.s32 1, %s2931_s20  ;;  %p65_p7 = scmp.ne.s32.totalorder %s2915_s16, %s2911_s15 }
 0x146   : > { %p3909_p1 = scmp.eq.s32.totalorder %s2935_s21, 0  ;;  %p71_p3 = scmp.ne.s32.totalorder %s2911_s15, %s2907_s14 }
 0x147   : > { %p3908_p6 = scmp.lt.s32.totalorder %s2935_s21, 4  ;;  %s513_s29 = sand.u32 1, %s2915_s16  }
 0x148   : > { %p67_p8 = por %p3909_p1, %p65_p7  ;;  %p3959_p9 = scmp.eq.s32.totalorder %s3114_s22, 0 }
 0x149   : > { %s1908_s27 = sshll.u32 %s513_s29, 4  ;;  %s1968_s2 = sshll.u32 %s2931_s20, 8 }
 0x14a   : > { %p3391_p10 = por %p3959_p9, %p71_p3  ;;  %s3961_s13 = sld [smem:[#allocation53_spill]] }
 0x14b   : > { %s517_s14 = scalar_lea.vmem [#allocation5], %s1908_s27  ;;  %p3403_p5 = pnand %p3908_p6, %p67_p8 }
 0x14c   : > { %s3960_s19 = scalar_select %p3391_p10, 1, 0 }
 0x14d   : > { %s524_s26 = sshll.u32 %s517_s14, 4  ;;  %s3409_s30 = scalar_lea.sflag [#allocation6], %s513_s29  ;;  %s3407_s26 = int_to_ptr.vmem [resolvable:$true] %s524_s26 }
 0x14e   : > { %p2669_p12 = pneg %p3403_p5 }
 0x150   : > { %s3399_s17 = scalar_lea.hbm %s3961_s13, %s1968_s2  ;;  %s2672_s27 = scalar_lea.hbm %s3961_s13, 512 }
 0x151   : > { %s2667_s0 = scalar_lea.hbm %s3399_s17, 256  ;;  %p2673_p2 = scmp.lt.u32.totalorder %s3399_s17, %s3961_s13 }
 0x152   : > { %p2668_p11 = scmp.ne.s32.totalorder %s3399_s17, %s2667_s0  ;;  %p2674_p4 = scmp.lt.u32.totalorder %s2672_s27, %s2667_s0 }
 0x153   : > { %p2676_p3 = scmp.lt.u32.totalorder %s2667_s0, %s3399_s17 }
 0x154   : > { %p2670_p13 = pnand %p2669_p12, %p2668_p11  ;;  %p2675_p7 = por %p2674_p4, %p2673_p2 }
 0x156   : > { %p2671_p0 = pneg %p2670_p13  ;;  %p2677_p8 = por %p2676_p3, %p2675_p7 }
 0x158   : > { %p2678_p9 = pnand %p2677_p8, %p2671_p0 }
 0x15a   : > { %2681 = shalt.err (!%p2678_p9)
}
 0x15b   : > { %s2682_s29 = scalar_lea.vmem %s3407_s26, 256  ;;  %s2951_s23 = smov [#allocation5]  }
 0x15c   : > { %p2683_p11 = scmp.ne.s32.totalorder %s3407_s26, %s2682_s29  ;;  %s2687_s14 = sshll.u32 %s2951_s23, 4  ;;  %s2688_s14 = int_to_ptr.vmem [resolvable:$false] %s2687_s14 }
 0x15d   : > { %s2689_s28 = scalar_lea.vmem %s2688_s14, 512  ;;  %p2690_p1 = scmp.lt.s32.totalorder %s3407_s26, %s2688_s14 }
 0x15e   : > { %p2685_p13 = pnand %p2683_p11, %p2669_p12  ;;  %p2691_p2 = scmp.lt.s32.totalorder %s2689_s28, %s2682_s29 }
 0x160   : > { %p2686_p6 = pneg %p2685_p13  ;;  %p2692_p4 = por %p2691_p2, %p2690_p1 }
 0x162   : > { %p2693_p7 = pnand %p2692_p4, %p2686_p6 }
 0x164   : > { %2696 = shalt.err (!%p2693_p7)
}
 0x165   : > { %s3963_s0 = smov 8   ;;  %s3964_s1 = smov 128  }
 0x166   : > { %s3965_s27 = sld [smem:[#allocation46_spill]]  ;;  %s3966_s2 = sld [smem:[#allocation42_spill]] }
 0x167   : > { %s3967_s25 = sld [smem:[#allocation41_spill]]  ;;  %s3968_s23 = sld [smem:[#allocation40_spill]] }
 0x168   : > { %s3969_s3 = sld [smem:[#allocation39_spill]]  ;;  %s1895_s29 = sadd.s32 4294967294, %s2935_s21  }
 0x169   : > { %2166 = dma.hbm_to_vmem [thread:$0]  (!%p3403_p5), %s3399_s17, 256, %s3407_s26, %s3409_s30, %s3964_s1, %s3964_s1, %s3963_s0  }
 0x16a   : > { %s3970_s28 = sld [smem:[#allocation38_spill]]  ;;  %p3972_p5 = scmp.eq.s32.totalorder %s2935_s21, 0 }
 0x16b   : > { %s3973_s26 = sld [smem:[#allocation37_spill]]  ;;  %p3975_p8 = scmp.eq.s32.totalorder %s3114_s22, 0 }
 0x16c   : > { %s48_s14 = sadd.s32 1, %s3965_s27  ;;  %s86_s18 = sadd.s32 1, %s3966_s2 }
 0x16d   : > { %p49_p1 = scmp.ge.s32.totalorder %s48_s14, 2  ;;  %p93_p6 = scmp.ne.s32.totalorder %s3966_s2, %s3967_s25 }
 0x16e   : > { %p3910_p12 = scmp.ne.s32.totalorder %s3967_s25, %s3968_s23  ;;  %s133_s5 = sadd.s32 1, %s3969_s3 }
 0x16f   : > { %s4042_s14 = smov (%p49_p1, %s48_s14), 0  ;;  %s4044_s24 = smov (!%p49_p1, %s51_s24), %s2931_s20 }
 0x170   : > { %3971 = sst [smem:[#allocation49_spill]] %s4042_s14  ;;  %s82_s17 = ssub.s32 %s3965_s27, %s4042_s14 }
 0x171   : > { %p3459_p0 = por %p93_p6, %p3972_p5  ;;  %p53_p3 = scmp.ge.s32.totalorder %s4044_s24, 2 }
 0x172   : > { %p3468_p9 = por %p3910_p12, %p3975_p8  ;;  %p131_p11 = scmp.eq.s32.totalorder %s82_s17, 0 }
 0x173   : > { %s4046_s24 = smov (%p53_p3, %s4044_s24), 0  ;;  %p140_p13 = scmp.ne.s32.totalorder %s3969_s3, %s3970_s28 }
 0x174   : > { %s3976_s4 = scalar_select %p3468_p9, 1, 0 }
 0x175   : > { %3977 = sst [smem:[#allocation50_spill]] %s4046_s24  ;;  %s55_s7 = ssub.s32 %s2931_s20, %s4046_s24 }
 0x176   : > { %s3476_s6 = scalar_select %p131_p11, %s3969_s3, %s133_s5  }
 0x177   : > { %p56_p2 = scmp.eq.s32.totalorder %s55_s7, 0  ;;  %s83_s8 = sor.u32 %s82_s17, %s55_s7 }
 0x178   : > { %p84_p4 = scmp.eq.s32.totalorder %s83_s8, 0  ;;  %p3978_p7 = pmov %p3972_p5 }
 0x179   : > { %s3980_s10 = sadd.s32 1, %s2915_s16  ;;  %p146_p5 = scmp.ne.s32.totalorder %s3970_s28, %s3973_s26 }
 0x17a   : > { %p3484_p1 = por %p140_p13, %p3978_p7  ;;  %p361_p3 = scmp.eq.s32.totalorder %s3114_s22, 3 }
 0x17b   : > { %s3491_s11 = scalar_select %p56_p2, %s2915_s16, %s3980_s10  }
 0x17c   : > { %s3494_s12 = scalar_select %p84_p4, %s3966_s2, %s86_s18  }
 0x17d   : > { %3981 = sst [smem:[#allocation51_spill]] %s3491_s11  ;;  %p367_p8 = scmp.eq.s32.totalorder %s1895_s29, 3 }
 0x17e   : > { %3982 = sst [smem:[#allocation52_spill]] %s3494_s12  ;;  %p3983_p11 = scmp.eq.s32.totalorder %s3114_s22, 0 }
 0x17f   : > { %p3509_p13 = por %p361_p3, %p93_p6  ;;  %p3986_p2 = scmp.ne.s32.totalorder %s3967_s25, %s3968_s23 }
 0x180   : > { %p3502_p12 = por %p146_p5, %p3983_p11  ;;  %s536_s18 = sand.u32 1, %s3966_s2  }
 0x181   : > { %s3985_s8 = scalar_select %p3509_p13, 1, 0 }
 0x182   : > { %s3984_s7 = scalar_select %p3502_p12, 1, 0 }
 0x183   : > { %p3516_p4 = por %p367_p8, %p3986_p2  ;;  %s1912_s28 = sshll.u32 %s2931_s20, 1 }
 0x184   : > { %s1911_s29 = sshll.u32 %s536_s18, 3  ;;  %s543_s17 = sadd.s32 %s3965_s27, %s1912_s28 }
 0x185   : > { %s3987_s10 = scalar_select %p3516_p4, 1, 0 }
 0x186   : > { %s1913_s26 = sshll.u32 %s543_s17, 7  ;;  %s3988_s24 = sld [smem:[#allocation54_spill]] }
 0x187   : > { %s538_s11 = scalar_lea.vmem [#allocation8], %s1911_s29  ;;  %p3989_p6 = scmp.lt.s32.totalorder %s2935_s21, 4 }
 0x188   : > { %s547_s25 = sshll.u32 %s538_s11, 4  ;;  %s1915_s23 = sshll.u32 %s3965_s27, 7  ;;  %s3528_s25 = int_to_ptr.vmem [resolvable:$true] %s547_s25 }
 0x189   : > { %p3534_p7 = pnand %p3989_p6, %p3459_p0  ;;  %s3991_s18 = sld [smem:[#allocation56_spill]] }
 0x18a   : > { %s3993_s17 = sand.u32 1, %s2935_s21  }
 0x18b   : > { %s535_s29 = scalar_lea.sflag [#allocation9], %s3993_s17  ;;  %p2699_p3 = pneg %p3534_p7 }
 0x18c   : > { %s3526_s14 = scalar_lea.hbm %s3988_s24, %s1913_s26  ;;  %s2702_s20 = scalar_lea.hbm %s3988_s24, 512 }
 0x18d   : > { %s2697_s26 = scalar_lea.hbm %s3526_s14, 128  ;;  %p2703_p11 = scmp.lt.u32.totalorder %s3526_s14, %s3988_s24 }
 0x18e   : > { %p2698_p5 = scmp.ne.s32.totalorder %s3526_s14, %s2697_s26  ;;  %p2704_p2 = scmp.lt.u32.totalorder %s2702_s20, %s2697_s26 }
 0x18f   : > { %s3992_s12 = smov %s3991_s18  ;;  %s3542_s28 = scalar_lea.hbm %s3991_s18, %s1915_s23 }
 0x190   : > { %p2700_p0 = pnand %p2699_p3, %p2698_p5  ;;  %p2705_p6 = por %p2704_p2, %p2703_p11 }
 0x191   : > { %p2706_p4 = scmp.lt.u32.totalorder %s2697_s26, %s3526_s14 }
 0x192   : > { %p2701_p8 = pneg %p2700_p0 }
 0x193   : > { %p2707_p13 = por %p2706_p4, %p2705_p6 }
 0x195   : > { %p2708_p12 = pnand %p2707_p13, %p2701_p8 }
 0x197   : > { %2711 = shalt.err (!%p2708_p12)
}
 0x198   : > { %s2712_s23 = scalar_lea.vmem %s3528_s25, 128  ;;  %s2952_s13 = smov [#allocation8]  }
 0x199   : > { %p2713_p5 = scmp.ne.s32.totalorder %s3528_s25, %s2712_s23  ;;  %s2717_s5 = sshll.u32 %s2952_s13, 4  ;;  %s2718_s5 = int_to_ptr.vmem [resolvable:$false] %s2717_s5 }
 0x19a   : > { %s2719_s16 = scalar_lea.vmem %s2718_s5, 256  ;;  %p2720_p10 = scmp.lt.s32.totalorder %s3528_s25, %s2718_s5 }
 0x19b   : > { %p2715_p0 = pnand %p2713_p5, %p2699_p3  ;;  %p2721_p11 = scmp.lt.s32.totalorder %s2719_s16, %s2712_s23 }
 0x19d   : > { %p2716_p9 = pneg %p2715_p0  ;;  %p2722_p2 = por %p2721_p11, %p2720_p10 }
 0x19f   : > { %p2723_p4 = pnand %p2722_p2, %p2716_p9 }
 0x1a1   : > { %2726 = shalt.err (!%p2723_p4)
}
 0x1a2   : > { %2169 = dma.hbm_to_vmem [thread:$0]  (!%p3534_p7), %s3526_s14, 128, %s3528_s25, %s535_s29  }
 0x1a3   : > { %s556_s20 = sand.u32 1, %s3969_s3   ;;  %p3994_p12 = scmp.lt.s32.totalorder %s2935_s21, 4 }
 0x1a4   : > { %s1914_s2 = sshll.u32 %s556_s20, 4  ;;  %s3996_s11 = sand.u32 1, %s2935_s21  }
 0x1a5   : > { %p3576_p13 = pnand %p3994_p12, %p3484_p1  ;;  %s558_s17 = scalar_lea.vmem [#allocation11], %s1914_s2 }
 0x1a6   : > { %s564_s26 = sshll.u32 %s558_s17, 4  ;;  %s3584_s30 = scalar_lea.sflag [#allocation12], %s3996_s11  ;;  %s3580_s26 = int_to_ptr.vmem [resolvable:$true] %s564_s26 }
 0x1a7   : > { %s2727_s27 = scalar_lea.hbm %s3542_s28, 256  ;;  %p2729_p9 = pneg %p3576_p13 }
 0x1a8   : > { %p2728_p10 = scmp.ne.s32.totalorder %s3542_s28, %s2727_s27  ;;  %s2732_s14 = scalar_lea.hbm %s3992_s12, 512 }
 0x1a9   : > { %p2733_p3 = scmp.lt.u32.totalorder %s3542_s28, %s3992_s12  ;;  %p2734_p8 = scmp.lt.u32.totalorder %s2732_s14, %s2727_s27 }
 0x1aa   : > { %p2730_p1 = pnand %p2729_p9, %p2728_p10  ;;  %p2736_p5 = scmp.lt.u32.totalorder %s2727_s27, %s3542_s28 }
 0x1ab   : > { %p2735_p6 = por %p2734_p8, %p2733_p3 }
 0x1ac   : > { %p2731_p7 = pneg %p2730_p1 }
 0x1ad   : > { %p2737_p0 = por %p2736_p5, %p2735_p6 }
 0x1af   : > { %p2738_p11 = pnand %p2737_p0, %p2731_p7 }
 0x1b1   : > { %2741 = shalt.err (!%p2738_p11)
}
 0x1b2   : > { %s2742_s23 = scalar_lea.vmem %s3580_s26, 256  ;;  %s2953_s13 = smov [#allocation11]  }
 0x1b3   : > { %p2743_p2 = scmp.ne.s32.totalorder %s3580_s26, %s2742_s23  ;;  %s2747_s5 = sshll.u32 %s2953_s13, 4  ;;  %s2748_s5 = int_to_ptr.vmem [resolvable:$false] %s2747_s5 }
 0x1b4   : > { %s2749_s16 = scalar_lea.vmem %s2748_s5, 512  ;;  %p2750_p10 = scmp.lt.s32.totalorder %s3580_s26, %s2748_s5 }
 0x1b5   : > { %p2745_p4 = pnand %p2743_p2, %p2729_p9  ;;  %p2751_p1 = scmp.lt.s32.totalorder %s2749_s16, %s2742_s23 }
 0x1b7   : > { %p2746_p12 = pneg %p2745_p4  ;;  %p2752_p3 = por %p2751_p1, %p2750_p10 }
 0x1b9   : > { %p2753_p8 = pnand %p2752_p3, %p2746_p12 }
 0x1bb   : > { %2756 = shalt.err (!%p2753_p8)
}
 0x1bc   : > { %s2954_s20 = smov 256   ;;  %s3997_s2 = sld [smem:[#allocation48_spill]] }
 0x1bd   : > { %2172 = dma.hbm_to_vmem [thread:$0]  (!%p3576_p13), %s3542_s28, 256, %s3580_s26, %s3584_s30, %s2954_s20, %s3964_s1, %s3963_s0  }
 0x1c2   : > { %p3998_p9 = scmp.ne.s32.totalorder %s3997_s2, 0 }
 0x1c3   : > { %s578_s17 = sand.u32 (!%p3998_p9), 1, %s2911_s15   ;;  %p3999_p7 = scmp.ne.s32.totalorder (!%p3998_p9), %s3960_s19, 0 }
 0x1c4   : > { %576 = sbr.rel (%p3998_p9) target bundleno = 3562 (0xdea), region = 72  ;;  %s3617_s11 = sshll.u32 (!%p3998_p9), %s578_s17, 4 }
 0x1c5   : > { %s579_s27 = scalar_lea.sflag (!%p3998_p9), [#allocation6], %s578_s17  ;;  %s582_s9 = scalar_lea.vmem (!%p3998_p9), [#allocation5], %s3617_s11 }
 0x1cb   : > { %2842 = dma.done.wait (%p3999_p7), %s579_s27, 256  }
 0x1cc   : > { %2844 = vsyncadd (%p3999_p7), %s579_s27, 4294967040  ;;  %s4000_s18 = sld [smem:[#allocation41_spill]]  ;;  %s587_s0 = sand.u32 1, %s3114_s22  }
 0x1cd   : > { %s588_s26 = scalar_lea.sflag [#allocation9], %s587_s0  ;;  %p4001_p13 = scmp.ne.s32.totalorder %s3976_s4, 0 }
 0x1d2   : > { %s589_s1 = sand.u32 1, %s4000_s18  }
 0x1d3   : > { %s3628_s28 = sshll.u32 %s589_s1, 3 }
 0x1d4   : > { %s591_s30 = scalar_lea.vmem [#allocation8], %s3628_s28 }
 0x1d5   : > { %2846 = dma.done.wait (%p4001_p13), %s588_s26, 128  }
 0x1d6   : > { %2848 = vsyncadd (%p4001_p13), %s588_s26, 4294967168  ;;  %p4002_p6 = scmp.eq.s32.totalorder %s3114_s22, 0 }
 0x1d8   : > { %2850 = dma.done.wait (%p4002_p6), [#allocation9], 512   ;;  %p4003_p5 = pmov %p4002_p6 }
 0x1d9   : > { %s4004_s19 = sld [smem:[#allocation38_spill]]  ;;  %s601_s25 = scalar_lea.sflag [#allocation12], %s587_s0 }
 0x1da   : > { %2852 = vsyncadd (%p4003_p5), [#allocation9], 4294966784  ;;  %p4005_p0 = scmp.ne.s32.totalorder %s3984_s7, 0 }
 0x1df   : > { %s602_s3 = sand.u32 1, %s4004_s19  }
 0x1e0   : > { %s3640_s14 = sshll.u32 %s602_s3, 4 }
 0x1e1   : > { %s604_s29 = scalar_lea.vmem [#allocation11], %s3640_s14 }
 0x1e2   : > { %2854 = dma.done.wait (%p4005_p0), %s601_s25, 256  }
 0x1e3   : > { %2856 = vsyncadd (%p4005_p0), %s601_s25, 4294967040  ;;  %p4006_p11 = pmov %p4003_p5 }
 0x1e4   : > { %p4007_p2 = pmov %p4003_p5 }
 0x1e5   : > { %2858 = dma.done.wait (%p4006_p11), [#allocation12], 256  }
 0x1e6   : > { %2860 = vsyncadd (%p4007_p2), [#allocation12], 4294967040  ;;  %p4008_p4 = pmov %p4007_p2 }
 0x1e7   : > { %p4009_p12 = pmov %p4007_p2 }
 0x1e8   : > { %2862 = dma.done.wait (%p4008_p4), [#allocation15], 512  }
 0x1e9   : > { %2864 = vsyncadd (%p4009_p12), [#allocation15], 4294966784  ;;  %p4010_p10 = pmov %p4007_p2 }
 0x1ea   : > { %p4011_p1 = pmov %p4007_p2 }
 0x1eb   : > { %2866 = dma.done.wait (%p4010_p10), [#allocation18], 512  }
 0x1ec   : > { %2868 = vsyncadd (%p4011_p1), [#allocation18], 4294966784  ;;  %p4012_p3 = pmov %p4011_p1 }
 0x1ed   : > { %p4013_p8 = pmov %p4011_p1 }
 0x1ee   : > { %2870 = dma.done.wait (%p4012_p3), [#allocation21], 768  }
 0x1ef   : > { %2872 = vsyncadd (%p4013_p8), [#allocation21], 4294966528  ;;  %p4014_p9 = pmov %p4011_p1 }
 0x1f0   : > { %p4015_p7 = pmov %p4011_p1 }
 0x1f1   : > { %2874 = dma.done.wait (%p4014_p9), [#allocation24], 32  }
 0x1f2   : > { %2876 = vsyncadd (%p4015_p7), [#allocation24], 4294967264  ;;  %s4016_s4 = sld [smem:[#allocation44_spill]]  ;;  %v3668_v0 = vld [vmem:[#allocation23] sm:$0x1]  ;;  %s692_s23 = scalar_lea.vmem [#allocation26], %s3628_s28 }
 0x1f8   : > { %s1931_s7 = sshll.u32 %s4016_s4, 3  ;;  %p1932_p13 = scmp.ne.s32.totalorder %s4016_s4, 0 }
 0x1f9   : > { %v700_v1 = vld [vmem:[%s582_s9] sm:$0xff] (!%p1932_p13)  ;;  %vm704_vm0 = vcmask (!%p1932_p13), 261120   ;;  %v701_v2 = vld [vmem:[%s582_s9 + $0x8] sm:$0xff] (!%p1932_p13)  ;;  %v2955_v9 = vmov (!%p1932_p13), 0.0   ;;  %vm2956_vm1 = vmmov (!%p1932_p13), 0   ;;  %v721_v17 = vlaneseq (!%p1932_p13)  ;;  %s2957_s22 = smov (!%p1932_p13), 124  }
 0x1fa   : > { %699 = sbr.rel (%p1932_p13) target bundleno = 1136 (0x470), region = 128  ;;  %v702_v3 = vmul.f32 (!%p1932_p13), %v700_v1, %v700_v1  ;;  %v703_v4 = vmul.f32 (!%p1932_p13), %v701_v2, %v701_v2  ;;  %v2343_v7 = vld [vmem:[#allocation14] sm:$0xff] (!%p1932_p13)   ;;  %v2344_v8 = vld [vmem:[#allocation16] sm:$0xff] (!%p1932_p13)   ;;  %2000 = vmatprep.subr.bf16.mxu0 (!%p1932_p13), %v2955_v9  ;;  %2008 = vmatprep.subr.bf16.mxu1 (!%p1932_p13), %v2955_v9  ;;  %v2345_v10 = vld [vmem:[#allocation14 + $0x8] sm:$0xff] (!%p1932_p13)   ;;  %vm921_vm2 = vcmask (!%p1932_p13), 130048   ;;  %s2958_s13 = smov (!%p1932_p13), 116  }
 0x1fb   : > { %2001 = vmatpush3.bf16.msra.mxu0 (!%p1932_p13), %v2343_v7  ;;  %2009 = vmatpush3.bf16.msra.mxu1 (!%p1932_p13), %v2344_v8  ;;  %v2346_v11 = vld [vmem:[#allocation16 + $0x8] sm:$0xff] (!%p1932_p13)   ;;  %v722_v19 = vshrl.u32 (!%p1932_p13), %v721_v17, 7  ;;  %v849_v29 = vld [vmem:[#allocation10 + $0x10] sm:$0xff] (!%p1932_p13)  ;;  %v850_v32 = vld [vmem:[#allocation10 + $0x18] sm:$0xff] (!%p1932_p13)  ;;  %s2959_s5 = smov (!%p1932_p13), 8   ;;  %s2960_s16 = smov (!%p1932_p13), 4  }
 0x1fc   : > { %v705_v5 = vsel (!%p1932_p13), %vm704_vm0, %v702_v3, 0.0  ;;  %v708_v6 = vsel (!%p1932_p13), %vm704_vm0, %v703_v4, 0.0  ;;  %2002 = vmatprep.subr.bf16.mxu0 (!%p1932_p13), %v2955_v9  ;;  %2010 = vmatprep.subr.bf16.mxu1 (!%p1932_p13), %v2955_v9  ;;  %vm871_vm3 = vcmask (!%p1932_p13), 31744   ;;  %v846_v44 = vld [vmem:[#allocation10] sm:$0xff] (!%p1932_p13)  ;;  %v847_v50 = vld [vmem:[#allocation10 + $0x8] sm:$0xff] (!%p1932_p13)  ;;  %vm879_vm4 = vcmask (!%p1932_p13), 64512  }
 0x1fd   : > { %706 = vadd.xlane.f32.xlu0 (!%p1932_p13), %v705_v5  ;;  %2004 = vmatprep.mubr.msk.bf16.mxu0 (!%p1932_p13), %vm2956_vm1, %v2955_v9  ;;  %v723_v20 = vsub.s32 (!%p1932_p13), 0, %v722_v19  ;;  %vm918_vm5 = vcmask (!%p1932_p13), 130112  }
 0x1fe   : > { %2012 = vmatprep.mubr.msk.bf16.mxu1 (!%p1932_p13), %vm2956_vm1, %v2955_v9 }
 0x1ff   : > { %2003 = vmatpush3.bf16.msra.mxu0 (!%p1932_p13), %v2345_v10  ;;  %2011 = vmatpush3.bf16.msra.mxu1 (!%p1932_p13), %v2346_v11  ;;  %v724_v23 = vrot.slane (!%p1932_p13), %v3668_v0, %v723_v20 }
 0x201   : > { %709 = vadd.xlane.f32.xlu0 %v708_v6 }
 0x28a   : > { %v707_v12 = vpop.xlane.xlu0 %706 }
 0x28b   : > { %v712_v13 = vmul.f32 0.03125, %v707_v12 }
 0x28d   : > { %v714_v14 = vadd.f32 1e-06, %v712_v13 }
 0x28e   : > { %v710_v15 = vpop.xlane.xlu0 %709 }
 0x28f   : > { %2347 = vrsqrt.f32 %v714_v14  ;;  %v713_v16 = vmul.f32 0.03125, %v710_v15 }
 0x291   : > { %v715_v18 = vadd.f32 1e-06, %v713_v16 }
 0x293   : > { %2349 = vrsqrt.f32 %v715_v18 }
 0x299   : > { %v2348_v21 = vpop.eup %2347 }
 0x29a   : > { %v718_v22 = vmul.f32 %v2348_v21, %v700_v1 }
 0x29c   : > { %v726_v26 = vmul.f32 %v724_v23, %v718_v22 }
 0x29d   : > { %v2350_v24 = vpop.eup %2349 }
 0x29e   : > { %v719_v25 = vmul.f32 %v2350_v24, %v701_v2 }
 0x2a0   : > { %v727_v27 = vmul.f32 %v724_v23, %v719_v25 }
 0x2a2   : > { %v728_v28 = vpack.c.bf16 %v727_v27, %v726_v26 }
 0x2a4   : > { %2005 = vmatmul.mubr.msk.bf16.vlgmr.msra.gmra.mrb[0].mxu0 %vm704_vm0, %v728_v28  ;;  %2013 = vmatmul.mubr.msk.bf16.vlgmr.msra.gmra.mrb[0].mxu1 %vm704_vm0, %v728_v28 }
 0x377   : > { %v782_v30 = vpop.f32.mrb[0].mxu0  ;;  %v839_v31 = vpop.f32.mrb[0].mxu1 }
 0x378   : > { %v2014_v33 = vpop.f32.mrb[1].mxu1  ;;  %897 = vrot.lane.b32.xlu0 %v782_v30, %s2957_s22  ;;  %v2006_v34 = vpop.f32.mrb[1].mxu0  ;;  %v853_v35 = vsub.f32 0.0, %v782_v30  ;;  %v851_v36 = vmul.f32 %v849_v29, %v782_v30 }
 0x379   : > { %v785_v37 = vpop.f32.mrb[2].mxu0  ;;  %v842_v38 = vpop.f32.mrb[2].mxu1 }
 0x37a   : > { %v920_v39 = vpack.c.bf16 %v842_v38, %v839_v31  ;;  %v2015_v40 = vpop.f32.mrb[3].mxu1  ;;  %891 = vrot.lane.b32.xlu1 %v853_v35, %s2958_s13  ;;  %v2007_v41 = vpop.f32.mrb[3].mxu0  ;;  %v852_v42 = vmul.f32 %v850_v32, %v785_v37  ;;  %v854_v43 = vsub.f32 0.0, %v785_v37 }
 0x37c   : > { %922 = vst.msk [vmem:[#allocation3] sm:$0xff] %vm921_vm2, %v920_v39  ;;  %885 = vrot.lane.b32.xlu0 %v850_v32, %s2959_s5 }
 0x37e   : > { %893 = vrot.lane.b32.xlu1 %v854_v43, %s2958_s13 }
 0x382   : > { %899 = vrot.lane.b32.xlu1 %v785_v37, %s2957_s22 }
 0x386   : > { %857 = vrot.lane.b32.xlu1 %v853_v35, %s2957_s22 }
 0x38a   : > { %865 = vrot.lane.b32.xlu1 %v782_v30, %s2960_s16 }
 0x38e   : > { %867 = vrot.lane.b32.xlu1 %v785_v37, %s2960_s16 }
 0x392   : > { %883 = vrot.lane.b32.xlu1 %v849_v29, %s2959_s5 }
 0x396   : > { %859 = vrot.lane.b32.xlu1 %v854_v43, %s2957_s22 }
 0x3ea   : > { %v898_v45 = vpop.permute.xlu0 %897 }
 0x3ec   : > { %v892_v46 = vpop.permute.xlu1 %891 }
 0x3ed   : > { %v903_v47 = vsel %vm871_vm3, %v892_v46, %v898_v45 }
 0x3ee   : > { %v905_v48 = vmul.f32 %v903_v47, %v846_v44  ;;  %v886_v4 = vpop.permute.xlu0 %885 }
 0x3ef   : > { %v890_v6 = vmul.f32 %v886_v4, %v785_v37 }
 0x3f0   : > { %909 = vrot.lane.b32.xlu1 %v905_v48, %s2959_s5  ;;  %v894_v49 = vpop.permute.xlu1 %893 }
 0x3f4   : > { %v900_v51 = vpop.permute.xlu1 %899 }
 0x3f5   : > { %v904_v52 = vsel %vm871_vm3, %v894_v49, %v900_v51 }
 0x3f6   : > { %v906_v53 = vmul.f32 %v904_v52, %v847_v50 }
 0x3f8   : > { %911 = vrot.lane.b32.xlu0 %v906_v53, %s2959_s5  ;;  %v858_v54 = vpop.permute.xlu1 %857 }
 0x3fc   : > { %v866_v55 = vpop.permute.xlu1 %865 }
 0x3fd   : > { %v872_v58 = vsel %vm871_vm3, %v858_v54, %v866_v55 }
 0x3fe   : > { %v874_v60 = vmul.f32 %v872_v58, %v846_v44 }
 0x400   : > { %v868_v56 = vpop.permute.xlu1 %867  ;;  %v876_v1 = vadd.f32 %v874_v60, %v851_v36 }
 0x404   : > { %v884_v57 = vpop.permute.xlu1 %883 }
 0x405   : > { %v889_v59 = vmul.f32 %v884_v57, %v782_v30 }
 0x408   : > { %v860_v61 = vpop.permute.xlu1 %859 }
 0x409   : > { %v873_v62 = vsel %vm871_vm3, %v860_v61, %v868_v56 }
 0x40a   : > { %v875_v63 = vmul.f32 %v873_v62, %v847_v50 }
 0x40c   : > { %v877_v2 = vadd.f32 %v875_v63, %v852_v42 }
 0x40e   : > { %v878_v3 = vpack.c.bf16 %v877_v2, %v876_v1 }
 0x410   : > { %880 = vst.msk [vmem:[#allocation2] sm:$0xff] %vm879_vm4, %v878_v3 }
 0x462   : > { %v910_v5 = vpop.permute.xlu1 %909 }
 0x463   : > { %v915_v8 = vadd.f32 %v910_v5, %v889_v59 }
 0x46a   : > { %v912_v7 = vpop.permute.xlu0 %911 }
 0x46b   : > { %v916_v9 = vadd.f32 %v912_v7, %v890_v6 }
 0x46d   : > { %v917_v10 = vpack.c.bf16 %v916_v9, %v915_v8 }
 0x46f   : > { %919 = vst.msk [vmem:[#allocation2] sm:$0xff] %vm918_vm5, %v917_v10 }
 0x470 PF: > { %v3687_v11 = vld [vmem:[%s591_s30] sm:$0xff]  ;;  %vm925_vm6 = vcmask 261120   ;;  %v2351_v14 = vld [vmem:[#allocation13] sm:$0xff]   ;;  %v2961_v15 = vmov 0.0   ;;  %vm2962_vm7 = vmmov 0   ;;  %v2352_v16 = vld [vmem:[#allocation13 + $0x8] sm:$0xff]   ;;  %v935_v19 = vlaneseq }
 0x471   : > { %v924_v12 = vmul.f32 %v3687_v11, %v3687_v11  ;;  %2016 = vmatprep.subr.bf16.mxu1 %v2961_v15  ;;  %2020 = vmatprep.mubr.msk.bf16.mxu1 %vm2962_vm7, %v2961_v15  ;;  %s2963_s20 = smov 116   ;;  %s2964_s2 = smov 120   ;;  %vm1060_vm8 = vcmask 31744   ;;  %v1001_v37 = vld [vmem:[%s604_s29] sm:$0xff]  ;;  %v1942_v39 = vld [vmem:[%s604_s29 + $0x8] sm:$0xff]  ;;  %vm1072_vm9 = vcmask 64512  }
 0x472   : > { %2017 = vmatpush3.bf16.msra.mxu1 %v2351_v14  ;;  %2030 = vmatprep.subr.bf16.mxu0 %v2961_v15  ;;  %v3701_v21 = vshrl.u32 %v935_v19, 7  ;;  %s2965_s17 = smov 124   ;;  %s2966_s11 = smov 108   ;;  %v1033_v14 = vstv %s1931_s7  ;;  %vm1122_vm11 = vcmask 130048   ;;  %vm1195_vm13 = vcmask 130112  }
 0x473   : > { %v926_v13 = vsel %vm925_vm6, %v924_v12, 0.0  ;;  %2018 = vmatprep.subr.bf16.mxu1 %v2961_v15  ;;  %2032 = vmatprep.mubr.msk.bf16.mxu0 %vm2962_vm7, %v2961_v15  ;;  %s2967_s27 = smov 4   ;;  %s2968_s9 = smov 16   ;;  %vm1364_vm14 = vcmask 195712   ;;  %vm1370_vm15 = vcmask 261312   ;;  %vm1607_vm0 = vcmask 523264  }
 0x474   : > { %927 = vadd.xlane.f32.xlu0 %v926_v13  ;;  %v937_v22 = vsub.s32 0, %v3701_v21  ;;  %s2969_s18 = smov 112   ;;  %s4017_s0 = sld [smem:[#allocation44_spill]]  ;;  %v1006_v12 = vadd.s32 8, %v3701_v21  ;;  %v1013_v13 = vand.u32 7, %v3701_v21 }
 0x475   : > { %s2970_s26 = smov 8   ;;  %s2971_s30 = smov 24  }
 0x476   : > { %2019 = vmatpush3.bf16.msra.mxu1 %v2352_v16  ;;  %v938_v23 = vrot.slane %v3668_v0, %v937_v22  ;;  %v1231_v35 = vld [vmem:[#allocation2] sm:$0xff]  ;;  %v1020_v16 = vand.u32 7, %v1006_v12  ;;  %s4018_s19 = sld [smem:[#allocation45_spill]]  ;;  %s1669_s4 = sshll.u32 %s692_s23, 4  ;;  %s3794_s4 = int_to_ptr.vmem [resolvable:$true] %s1669_s4 }
 0x477   : > { %2024 = vmatprep.subr.bf16.mxu1 %v2961_v15  ;;  %v1077_v43 = vsel %vm1072_vm9, %v1231_v35, 0  ;;  %s4020_s13 = sld [smem:[#allocation66_spill]]  ;;  %s1654_s16 = scalar_lea.sflag [#allocation7], %s589_s1 }
 0x478   : > { %p4021_p5 = scmp.ne.s32.totalorder %s3985_s8, 0 }
 0x47c   : > { %s1964_s14 = sshll.u32 %s4018_s19, 1 }
 0x47d   : > { %s1665_s25 = sadd.s32 %s4017_s0, %s1964_s14 }
 0x47e   : > { %s1965_s29 = sshll.u32 %s1665_s25, 7 }
 0x47f   : > { %s3792_s5 = scalar_lea.hbm %s4020_s13, %s1965_s29 }
 0x501   : > { %v928_v17 = vpop.xlane.xlu0 %927 }
 0x502   : > { %v930_v18 = vmul.f32 0.03125, %v928_v17  ;;  %v1008_v17 = vand.u32 127, %v935_v19  ;;  %v1232_v19 = vld [vmem:[#allocation3] sm:$0xff] }
 0x503   : > { %2031 = vmatpush3.bf16.msra.mxu0 %v1232_v19 }
 0x504   : > { %v931_v20 = vadd.f32 1e-06, %v930_v18  ;;  %v1034_v18 = vadd.s32 %v1033_v14, %v1013_v13  ;;  %2042 = vmatprep.subr.bf16.mxu0 %v2961_v15 }
 0x506   : > { %2363 = vrsqrt.f32 %v931_v20  ;;  %v1035_v20 = vadd.s32 %v1033_v14, %v1020_v16  ;;  %vm1036_vm10 = vcmp.ge.s32.totalorder %v1034_v18, %v1008_v17 }
 0x508   : > { %vm1037_vm12 = vcmp.ge.s32.totalorder %v1035_v20, %v1008_v17 }
 0x510   : > { %v2364_v24 = vpop.eup %2363 }
 0x511   : > { %v933_v25 = vmul.f32 %v2364_v24, %v3687_v11 }
 0x513   : > { %v940_v26 = vmul.f32 %v938_v23, %v933_v25 }
 0x515   : > { %v941_v27 = vpack.c.bf16 %v940_v26, %v940_v26 }
 0x517   : > { %2021 = vmatmul.mubr.msk.bf16.vlgmr.msra.gmra.mrb[0].mxu1 %vm925_vm6, %v941_v27 }
 0x518   : > { %2026 = vmatprep.mubr.msk.bf16.mxu1 %vm2962_vm7, %v2961_v15  ;;  %2025 = vmatpush3.bf16.xpose.msra.mxu1 %v1077_v43 }
 0x519   : > { %2036 = vmatprep.subr.bf16.mxu1 %v2961_v15 }
 0x5ea   : > { %v995_v28 = vpop.f32.mrb[0].mxu1 }
 0x5eb   : > { %1209 = vrot.lane.b32.xlu1 %v995_v28, %s2963_s20  ;;  %1039 = vrot.lane.b32.xlu0 %v995_v28, %s2964_s2  ;;  %v2022_v29 = vpop.f32.mrb[1].mxu1  ;;  %v1044_v0 = vsub.f32 0.0, %v995_v28  ;;  %v1042_v61 = vmul.f32 %v1942_v39, %v995_v28 }
 0x5ec   : > { %v998_v30 = vpop.f32.mrb[2].mxu1 }
 0x5ed   : > { %v2023_v31 = vpop.f32.mrb[3].mxu1 }
 0x5ef   : > { %1048 = vrot.lane.b32.xlu0 %v1044_v0, %s2965_s17  ;;  %1203 = vrot.lane.b32.xlu1 %v1044_v0, %s2966_s11 }
 0x5f3   : > { %1054 = vrot.lane.b32.xlu0 %v995_v28, %s2967_s27 }
 0x5f7   : > { %1238 = vrot.lane.b32.xlu0 %v1231_v35, %s2964_s2 }
 0x65d   : > { %v1040_v32 = vpop.permute.xlu0 %1039  ;;  %v1210_v33 = vpop.permute.xlu1 %1209 }
 0x65e   : > { %v1045_v34 = vsub.f32 0.0, %v1040_v32  ;;  %v1043_v1 = vmul.f32 %v1942_v39, %v1040_v32 }
 0x660   : > { %1205 = vrot.lane.b32.xlu1 %v1045_v34, %s2966_s11 }
 0x661   : > { %v1204_v36 = vpop.permute.xlu1 %1203  ;;  %v1049_v47 = vpop.permute.xlu0 %1048 }
 0x662   : > { %v1215_v38 = vsel %vm1060_vm8, %v1204_v36, %v1210_v33 }
 0x663   : > { %v1217_v40 = vmul.f32 %v1215_v38, %v1001_v37 }
 0x664   : > { %1211 = vrot.lane.b32.xlu1 %v1040_v32, %s2963_s20  ;;  %s2757_s20 = scalar_lea.vmem %s3794_s4, 128 }
 0x665   : > { %v1055_v52 = vpop.permute.xlu0 %1054  ;;  %p2758_p6 = scmp.ne.s32.totalorder %s3794_s4, %s2757_s20 }
 0x666   : > { %v1061_v55 = vsel %vm1060_vm8, %v1049_v47, %v1055_v52 }
 0x667   : > { %v1063_v60 = vmul.f32 %v1061_v55, %v1001_v37  ;;  %p2759_p0 = pnand %p2758_p6, %p4021_p5 }
 0x668   : > { %1198 = vrot.lane.b32.xlu1 %v1942_v39, %s2968_s9 }
 0x669   : > { %v1065_v2 = vadd.f32 %v1063_v60, %v1042_v61  ;;  %v1239_v5 = vpop.permute.xlu0 %1238  ;;  %p2760_p11 = pneg %p2759_p0 }
 0x66a   : > { %v1244_v9 = vsel %vm1072_vm9, %v1239_v5, 0 }
 0x66b   : > { %v1067_v6 = vmul.f32 0.35355338, %v1065_v2 }
 0x66c   : > { %1221 = vrot.lane.b32.xlu1 %v1217_v40, %s2968_s9 }
 0x6d2   : > { %v1206_v41 = vpop.permute.xlu1 %1205 }
 0x6d6   : > { %v1212_v42 = vpop.permute.xlu1 %1211 }
 0x6d7   : > { %v1216_v44 = vsel %vm1060_vm8, %v1206_v41, %v1212_v42 }
 0x6d8   : > { %v1218_v45 = vmul.f32 %v1216_v44, %v1001_v37 }
 0x6da   : > { %1223 = vrot.lane.b32.xlu1 %v1218_v45, %s2968_s9  ;;  %v1199_v46 = vpop.permute.xlu1 %1198 }
 0x6db   : > { %v1201_v49 = vmul.f32 %v1199_v46, %v995_v28  ;;  %v1202_v50 = vmul.f32 %v1199_v46, %v1040_v32 }
 0x6de   : > { %1050 = vrot.lane.b32.xlu1 %v1045_v34, %s2965_s17  ;;  %v1222_v48 = vpop.permute.xlu1 %1221 }
 0x6df   : > { %v1227_v51 = vadd.f32 %v1222_v48, %v1201_v49 }
 0x6e1   : > { %v1229_v56 = vmul.f32 0.35355338, %v1227_v51 }
 0x6e2   : > { %1056 = vrot.lane.b32.xlu1 %v1040_v32, %s2967_s27 }
 0x74c   : > { %v1224_v53 = vpop.permute.xlu1 %1223 }
 0x74d   : > { %v1228_v54 = vadd.f32 %v1224_v53, %v1202_v50 }
 0x74f   : > { %v1230_v57 = vmul.f32 0.35355338, %v1228_v54 }
 0x750   : > { %v1051_v58 = vpop.permute.xlu1 %1050 }
 0x751   : > { %v1233_v59 = vpack.c.bf16 %v1230_v57, %v1229_v56 }
 0x753   : > { %1235 = vrot.lane.b32.xlu1 %v1233_v59, %s2969_s18 }
 0x754   : > { %v1057_v62 = vpop.permute.xlu1 %1056 }
 0x755   : > { %v1062_v63 = vsel %vm1060_vm8, %v1051_v58, %v1057_v62 }
 0x756   : > { %v1064_v3 = vmul.f32 %v1062_v63, %v1001_v37 }
 0x758   : > { %v1066_v4 = vadd.f32 %v1064_v3, %v1043_v1 }
 0x75a   : > { %v1068_v7 = vmul.f32 0.35355338, %v1066_v4 }
 0x75c   : > { %v1071_v8 = vpack.c.bf16 %v1068_v7, %v1067_v6 }
 0x75e   : > { %2027 = vmatmul.mubr.msk.bf16.vlgmr.msra.gmra.mrb[4].mxu1 %vm1072_vm9, %v1071_v8  ;;  %v2353_v8 = vld [vmem:[#allocation17] sm:$0xff]  }
 0x75f   : > { %2037 = vmatpush3.bf16.xpose.msra.mxu1 %v1244_v9  ;;  %2038 = vmatprep.mubr.msk.bf16.mxu1 %vm2962_vm7, %v2961_v15  ;;  %v2354_v9 = vld [vmem:[#allocation17 + $0x8] sm:$0xff]  }
 0x760   : > { %2048 = vmatprep.subr.bf16.mxu1 %v2961_v15 }
 0x7c5   : > { %v1236_v10 = vpop.permute.xlu1 %1235 }
 0x7c6   : > { %2039 = vmatmul.mubr.msk.bf16.vlgmr.msra.gmra.mrb[8].mxu1 %vm1072_vm9, %v1236_v10 }
 0x7c7   : > { %2052 = vmatprep.mubr.msk.bf16.mxu1 %vm2962_vm7, %v2961_v15  ;;  %2049 = vmatpush3.bf16.msra.mxu1 %v2353_v8 }
 0x7c8   : > { %2050 = vmatprep.subr.bf16.mxu1 %v2961_v15 }
 0x7cb   : > { %2051 = vmatpush3.bf16.msra.mxu1 %v2354_v9 }
 0x7cc   : > { %2064 = vmatprep.subr.bf16.mxu1 %v2961_v15 }
 0x831   : > { %v1113_v22 = vpop.f32.mrb[4].mxu1 }
 0x832   : > { %v1120_v23 = vsel %vm1036_vm10, %v1113_v22, -1e+30  ;;  %v2028_v24 = vpop.f32.mrb[5].mxu1 }
 0x833   : > { %v1116_v25 = vpop.f32.mrb[6].mxu1  ;;  %v1123_v26 = vsel %vm1122_vm11, %v1120_v23, -inf }
 0x834   : > { %v1121_v27 = vsel %vm1037_vm12, %v1116_v25, -1e+30  ;;  %1124 = vmax.xlane.f32.xlu0 %v1123_v26  ;;  %v2029_v21 = vpop.f32.mrb[7].mxu1 }
 0x835   : > { %v1126_v28 = vsel %vm1122_vm11, %v1121_v27, -inf }
 0x836   : > { %1127 = vmax.xlane.f32.xlu1 %v1126_v28 }
 0x847   : > { %1309 = vrot.lane.b32.xlu1 %v1232_v19, %s2964_s2  ;;  %s2972_s2 = smov [#allocation26]  }
 0x848   : > { %s2761_s17 = sshll.u32 %s2972_s2, 4  ;;  %s2762_s17 = int_to_ptr.vmem [resolvable:$false] %s2761_s17 }
 0x849   : > { %s2763_s11 = scalar_lea.vmem %s2762_s17, 256  ;;  %p2764_p2 = scmp.lt.s32.totalorder %s3794_s4, %s2762_s17 }
 0x84a   : > { %p2765_p4 = scmp.lt.s32.totalorder %s2763_s11, %s2757_s20 }
 0x84c   : > { %p2766_p12 = por %p2765_p4, %p2764_p2 }
 0x84e   : > { %p2767_p10 = pnand %p2766_p12, %p2760_p11 }
 0x899   : > { %v1280_v29 = vpop.f32.mrb[8].mxu1 }
 0x89a   : > { %v1287_v30 = vsel %vm1036_vm10, %v1280_v29, -1e+30  ;;  %v2040_v31 = vpop.f32.mrb[9].mxu1 }
 0x89b   : > { %v1283_v0 = vpop.f32.mrb[10].mxu1  ;;  %v1289_v32 = vsel %vm1122_vm11, %v1287_v30, -inf }
 0x89c   : > { %v1288_v33 = vsel %vm1037_vm12, %v1283_v0, -1e+30  ;;  %1290 = vmax.xlane.f32.xlu0 %v1289_v32  ;;  %v2041_v34 = vpop.f32.mrb[11].mxu1  ;;  %v2355_v0 = vld [vmem:[#allocation19] sm:$0xff]   ;;  %v2356_v32 = vld [vmem:[#allocation20] sm:$0xff]  }
 0x89d   : > { %v1292_v35 = vsel %vm1122_vm11, %v1288_v33, -inf }
 0x8a0   : > { %1293 = vmax.xlane.f32.xlu0 %v1292_v35 }
 0x8c1   : > { %v1125_v36 = vpop.xlane.xlu0 %1124 }
 0x8c2   : > { %v1129_v37 = vsub.f32 %v1120_v23, %v1125_v36 }
 0x8c3   : > { %v1128_v38 = vpop.xlane.xlu1 %1127 }
 0x8c4   : > { %v1131_v39 = vmul.f32 1.442695, %v1129_v37  ;;  %v1130_v40 = vsub.f32 %v1121_v27, %v1128_v38  ;;  %v1950_v38 = vld [vmem:[#allocation25] ss:$0 sm:$0xff] }
 0x8c6   : > { %v1133_v41 = vmul.f32 1.442695, %v1130_v40  ;;  %2365 = vpow2.f32 %v1131_v39 }
 0x8c7   : > { %v1310_v46 = vpop.permute.xlu1 %1309 }
 0x8c8   : > { %2367 = vpow2.f32 %v1133_v41 }
 0x8d0   : > { %v2366_v42 = vpop.eup %2365 }
 0x8d1   : > { %v1135_v58 = vsel %vm1122_vm11, %v2366_v42, 0.0 }
 0x8d2   : > { %v2368_v43 = vpop.eup %2367 }
 0x8d3   : > { %v1138_v44 = vsel %vm1122_vm11, %v2368_v43, 0.0  ;;  %v1141_v45 = vpack.c.bf16 %v2368_v43, %v2366_v42  ;;  %v2359_v42 = vld [vmem:[#allocation22] sm:$0xff]   ;;  %v2360_v43 = vld [vmem:[#allocation22 + $0x8] sm:$0xff]  }
 0x8d4   : > { %1139 = vadd.xlane.f32.xlu0 %v1138_v44  ;;  %v2361_v44 = vld [vmem:[#allocation22 + $0x10] sm:$0xff]  }
 0x8d5   : > { %2033 = vmatmul.mubr.msk.bf16.vlgmr.msra.gmra.mrb[0].mxu0 %vm1122_vm11, %v1141_v45  ;;  %v2362_v45 = vld [vmem:[#allocation22 + $0x18] sm:$0xff]  }
 0x8d6   : > { %2043 = vmatpush3.bf16.msra.mxu0 %v1310_v46  ;;  %2044 = vmatprep.mubr.msk.bf16.mxu0 %vm2962_vm7, %v2961_v15 }
 0x8d7   : > { %2056 = vmatprep.subr.bf16.mxu0 %v2961_v15 }
 0x929   : > { %v1291_v47 = vpop.xlane.xlu0 %1290 }
 0x92a   : > { %v1295_v48 = vsub.f32 %v1287_v30, %v1291_v47 }
 0x92c   : > { %v1297_v49 = vmul.f32 1.442695, %v1295_v48 }
 0x92d   : > { %v1294_v50 = vpop.xlane.xlu0 %1293 }
 0x92e   : > { %2369 = vpow2.f32 %v1297_v49  ;;  %v1296_v51 = vsub.f32 %v1288_v33, %v1294_v50  ;;  %v2357_v33 = vld [vmem:[#allocation19 + $0x8] sm:$0xff]  }
 0x930   : > { %v1299_v52 = vmul.f32 1.442695, %v1296_v51 }
 0x932   : > { %2371 = vpow2.f32 %v1299_v52 }
 0x938   : > { %v2370_v53 = vpop.eup %2369 }
 0x939   : > { %v1301_v54 = vsel %vm1122_vm11, %v2370_v53, 0.0 }
 0x93a   : > { %1302 = vadd.xlane.f32.xlu0 %v1301_v54 }
 0x93c   : > { %v2372_v55 = vpop.eup %2371 }
 0x93d   : > { %v1304_v56 = vsel %vm1122_vm11, %v2372_v55, 0.0  ;;  %v1307_v57 = vpack.c.bf16 %v2372_v55, %v2370_v53 }
 0x93e   : > { %1305 = vadd.xlane.f32.xlu0 %v1304_v56 }
 0x93f   : > { %2045 = vmatmul.mubr.msk.bf16.vlgmr.msra.gmra.mrb[4].mxu0 %vm1122_vm11, %v1307_v57 }
 0x940   : > { %2060 = vmatprep.mubr.msk.bf16.mxu0 %vm2962_vm7, %v2961_v15  ;;  %2057 = vmatpush3.bf16.msra.mxu0 %v2355_v0 }
 0x941   : > { %2058 = vmatprep.subr.bf16.mxu0 %v2961_v15 }
 0x942   : > { %1136 = vadd.xlane.f32.xlu0 %v1135_v58 }
 0x944   : > { %2059 = vmatpush3.bf16.msra.mxu0 %v2357_v33 }
 0x945   : > { %2072 = vmatprep.subr.bf16.mxu0 %v2961_v15 }
 0x961   : > { %v1140_v59 = vpop.xlane.xlu0 %1139 }
 0x962   : > { %2373 = vrcp.f32 %v1140_v59 }
 0x96c   : > { %v2374_v62 = vpop.eup %2373 }
 0x9a8   : > { %v1179_v60 = vpop.f32.mrb[0].mxu0 }
 0x9a9   : > { %v2034_v61 = vpop.f32.mrb[1].mxu0 }
 0x9aa   : > { %v1182_v63 = vpop.f32.mrb[2].mxu0 }
 0x9ab   : > { %v1189_v1 = vmul.f32 %v2374_v62, %v1182_v63  ;;  %v2035_v2 = vpop.f32.mrb[3].mxu0 }
 0x9ad   : > { %1192 = vrot.lane.b32.xlu0 %v1189_v1, %s2970_s26 }
 0x9c7   : > { %v1303_v3 = vpop.xlane.xlu0 %1302 }
 0x9cb   : > { %v1306_v4 = vpop.xlane.xlu0 %1305 }
 0x9cf   : > { %v1137_v5 = vpop.xlane.xlu0 %1136 }
 0x9d0   : > { %2375 = vrcp.f32 %v1137_v5 }
 0x9d1   : > { %2377 = vrcp.f32 %v1303_v3 }
 0x9d2   : > { %2379 = vrcp.f32 %v1306_v4 }
 0x9da   : > { %v2376_v6 = vpop.eup %2375 }
 0x9db   : > { %v1188_v7 = vmul.f32 %v2376_v6, %v1179_v60  ;;  %v2378_v10 = vpop.eup %2377 }
 0x9dc   : > { %v2380_v16 = vpop.eup %2379 }
 0x9dd   : > { %1190 = vst.msk [vmem:[#allocation4] sm:$0xff] %vm1072_vm9, %v1188_v7 }
 0xa12   : > { %v1349_v12 = vpop.f32.mrb[4].mxu0 }
 0xa13   : > { %v1358_v13 = vmul.f32 %v2378_v10, %v1349_v12  ;;  %v2046_v14 = vpop.f32.mrb[5].mxu0 }
 0xa14   : > { %v1352_v17 = vpop.f32.mrb[6].mxu0 }
 0xa15   : > { %v1359_v18 = vmul.f32 %v2380_v16, %v1352_v17  ;;  %v2047_v20 = vpop.f32.mrb[7].mxu0  ;;  %1361 = vrot.lane.b32.xlu1 %v1358_v13, %s2968_s9 }
 0xa19   : > { %1367 = vrot.lane.b32.xlu1 %v1359_v18, %s2971_s30 }
 0xa1f   : > { %v1193_v22 = vpop.permute.xlu0 %1192 }
 0xa20   : > { %1196 = vst.msk [vmem:[#allocation4] sm:$0xff] %vm1195_vm13, %v1193_v22 }
 0xa87   : > { %v1362_v23 = vpop.permute.xlu1 %1361 }
 0xa88   : > { %1365 = vst.msk [vmem:[#allocation4] sm:$0xff] %vm1364_vm14, %v1362_v23 }
 0xa8b   : > { %v1368_v24 = vpop.permute.xlu1 %1367 }
 0xa8c   : > { %1371 = vst.msk [vmem:[#allocation4] sm:$0xff] %vm1370_vm15, %v1368_v24 }
 0xa93   : > { %v1372_v25 = vld [vmem:[#allocation4] sm:$0xff] }
 0xa94   : > { %v1373_v26 = vpack.c.bf16 %v1372_v25, %v1372_v25 }
 0xa96   : > { %2053 = vmatmul.mubr.msk.bf16.vlgmr.msra.gmra.mrb[12].mxu1 %vm925_vm6, %v1373_v26 }
 0xa97   : > { %2068 = vmatprep.mubr.msk.bf16.mxu1 %vm2962_vm7, %v2961_v15  ;;  %2065 = vmatpush3.bf16.msra.mxu1 %v2356_v32 }
 0xa98   : > { %2066 = vmatprep.subr.bf16.mxu1 %v2961_v15 }
 0xb69   : > { %v1427_v27 = vpop.f32.mrb[12].mxu1 }
 0xb6a   : > { %v3768_v21 = vadd.f32 %v1427_v27, %v3687_v11  ;;  %v2054_v28 = vpop.f32.mrb[13].mxu1  ;;  %v2358_v11 = vld [vmem:[#allocation20 + $0x8] sm:$0xff]  }
 0xb6b   : > { %v1430_v19 = vpop.f32.mrb[14].mxu1  ;;  %2067 = vmatpush3.bf16.msra.mxu1 %v2358_v11 }
 0xb6c   : > { %v2055_v29 = vpop.f32.mrb[15].mxu1  ;;  %v1434_v30 = vmul.f32 %v3768_v21, %v3768_v21 }
 0xb6e   : > { %v1435_v31 = vsel %vm925_vm6, %v1434_v30, 0.0 }
 0xb6f   : > { %1436 = vadd.xlane.f32.xlu1 %v1435_v31 }
 0xbfc   : > { %v1437_v34 = vpop.xlane.xlu1 %1436 }
 0xbfd   : > { %v1438_v35 = vmul.f32 0.03125, %v1437_v34 }
 0xbff   : > { %v1439_v36 = vadd.f32 1e-06, %v1438_v35 }
 0xc01   : > { %2381 = vrsqrt.f32 %v1439_v36 }
 0xc0b   : > { %v2382_v37 = vpop.eup %2381 }
 0xc0c   : > { %v1441_v39 = vmul.f32 %v2382_v37, %v3768_v21 }
 0xc0e   : > { %v1449_v40 = vmul.f32 %v1950_v38, %v1441_v39 }
 0xc10   : > { %v1450_v41 = vpack.c.bf16 %v1449_v40, %v1449_v40 }
 0xc12   : > { %2061 = vmatmul.mubr.msk.bf16.vlgmr.msra.gmra.mrb[8].mxu0 %vm925_vm6, %v1450_v41  ;;  %2069 = vmatmul.mubr.msk.bf16.vlgmr.msra.gmra.mrb[16].mxu1 %vm925_vm6, %v1450_v41 }
 0xc13   : > { %2080 = vmatprep.mubr.msk.bf16.mxu0 %vm2962_vm7, %v2961_v15  ;;  %2073 = vmatpush3.bf16.msra.mxu0 %v2359_v42 }
 0xc14   : > { %2074 = vmatprep.subr.bf16.mxu0 %v2961_v15 }
 0xc17   : > { %2075 = vmatpush3.bf16.msra.mxu0 %v2360_v43 }
 0xc18   : > { %2076 = vmatprep.subr.bf16.mxu0 %v2961_v15 }
 0xc1b   : > { %2077 = vmatpush3.bf16.msra.mxu0 %v2361_v44 }
 0xc1c   : > { %2078 = vmatprep.subr.bf16.mxu0 %v2961_v15 }
 0xc1f   : > { %2079 = vmatpush3.bf16.msra.mxu0 %v2362_v45 }
 0xce5   : > { %v1504_v46 = vpop.f32.mrb[8].mxu0  ;;  %v1560_v47 = vpop.f32.mrb[16].mxu1 }
 0xce6   : > { %v1957_v48 = vmul.f32 -1.442695, %v1504_v46  ;;  %v2062_v49 = vpop.f32.mrb[9].mxu0  ;;  %v2070_v50 = vpop.f32.mrb[17].mxu1 }
 0xce7   : > { %v1507_v51 = vpop.f32.mrb[10].mxu0  ;;  %v1563_v52 = vpop.f32.mrb[18].mxu1 }
 0xce8   : > { %2383 = vpow2.f32 %v1957_v48  ;;  %v2063_v53 = vpop.f32.mrb[11].mxu0  ;;  %v2071_v54 = vpop.f32.mrb[19].mxu1 }
 0xcf2   : > { %v2384_v55 = vpop.eup %2383 }
 0xcf3   : > { %v1569_v56 = vadd.f32 1.0, %v2384_v55 }
 0xcf5   : > { %2385 = vrcp.f32 %v1569_v56 }
 0xcff   : > { %v2386_v57 = vpop.eup %2385 }
 0xd00   : > { %v1572_v15 = vmul.f32 %v2386_v57, %v1504_v46 }
 0xd02   : > { %v1573_v58 = vmul.f32 %v1572_v15, %v1560_v47 }
 0xd04   : > { %v1574_v59 = vpack.c.bf16 %v1573_v58, %v1573_v58 }
 0xd06   : > { %2081 = vmatmul.mubr.msk.bf16.vlgmr.msra.gmra.mrb[12].mxu0 %vm1607_vm0, %v1574_v59 }
 0xdd9   : > { %v1645_v60 = vpop.f32.mrb[12].mxu0 }
 0xdda   : > { %v1651_v61 = vadd.f32 %v1645_v60, %v3768_v21  ;;  %v2082_v62 = vpop.f32.mrb[13].mxu0 }
 0xddb   : > { %v1648_v63 = vpop.f32.mrb[14].mxu0 }
 0xddc   : > { %1652 = vst.msk [vmem:[%s692_s23] sm:$0xff] %vm925_vm6, %v1651_v61  ;;  %v2083_v1 = vpop.f32.mrb[15].mxu0 }
 0xddd   : > { %2770 = shalt.err (!%p2767_p10)
}
 0xdde   : > { %s2771_s1 = scalar_lea.hbm %s3792_s5, 128  ;;  %s2775_s27 = scalar_lea.hbm %s4020_s13, 512 }
 0xddf   : > { %p2772_p1 = scmp.ne.s32.totalorder %s3792_s5, %s2771_s1  ;;  %p2776_p9 = scmp.lt.u32.totalorder %s3792_s5, %s4020_s13 }
 0xde0   : > { %p2777_p7 = scmp.lt.u32.totalorder %s2775_s27, %s2771_s1  ;;  %p2779_p6 = scmp.lt.u32.totalorder %s2771_s1, %s3792_s5 }
 0xde1   : > { %p2773_p3 = pnand %p2772_p1, %p4021_p5 }
 0xde2   : > { %p2778_p13 = por %p2777_p7, %p2776_p9 }
 0xde3   : > { %p2774_p8 = pneg %p2773_p3 }
 0xde4   : > { %p2780_p0 = por %p2779_p6, %p2778_p13 }
 0xde6   : > { %p2781_p11 = pnand %p2780_p0, %p2774_p8 }
 0xde8   : > { %2784 = shalt.err (!%p2781_p11)
}
 0xde9   : > { %2130 = dma.vmem_to_hbm [thread:$0]  (%p4021_p5), %s3794_s4, 128, %s3792_s5, %s1654_s16  }
 0xdea PF: > { %s4022_s0 = sld [smem:[#allocation40_spill]]  ;;  %p2198_p2 = scmp.ge.s32.totalorder %s2935_s21, 2 }
 0xdeb   : > { %p4023_p4 = scmp.ne.s32.totalorder %s3987_s10, 0 }
 0xded   : > { %p2174_p12 = pnand %p2198_p2, %p4023_p4 }
 0xdf0   : > { %s1681_s26 = sand.u32 1, %s4022_s0  }
 0xdf1   : > { %s1682_s30 = scalar_lea.sflag [#allocation7], %s1681_s26 }
 0xdf2   : > { %2878 = dma.done.wait (!%p2174_p12), %s1682_s30, 128  }
 0xdf3   : > { %2880 = vsyncadd (!%p2174_p12), %s1682_s30, 4294967168  ;;  %s39_s21 = sadd.s32 1, %s2935_s21   ;;  %s4025_s25 = sld [smem:[#allocation38_spill]] }
 0xdf4   : > { %p3827_p10 = scmp.ge.s32.totalorder %s39_s21, 6   ;;  %s4026_s26 = sld [smem:[#allocation39_spill]] }
 0xdf5   : > { %s4027_s28 = sld [smem:[#allocation41_spill]]  ;;  %s4028_s29 = sld [smem:[#allocation42_spill]] }
 0xdf6   : > { %s4029_s30 = sld [smem:[#allocation52_spill]]  ;;  %s4030_s8 = sld [smem:[#allocation43_spill]] }
 0xdf7   : > { %s4031_s16 = sld [smem:[#allocation51_spill]]  ;;  %s4032_s17 = sld [smem:[#allocation46_spill]] }
 0xdf8   : > { %s4033_s18 = sld [smem:[#allocation47_spill]]  ;;  %s4034_s10 = sld [smem:[#allocation49_spill]] }
 0xdf9   : > { %s4035_s20 = sld [smem:[#allocation50_spill]]  ;;  %s4037_s27 = smov %s3476_s6 }
 0xdfa   : > { %s4038_s14 = smov %s2911_s15  ;;  %38 = sbr.rel (!%p3827_p10) target bundleno = 33 (0x21), region = 189 }
 0xdfc   : > { %s4039_s15 = smov %s4030_s8 }
 0xdfe   : > { %s4040_s19 = smov %s4034_s10 }
 0xe01   :  { %1687 = vsyncpa [#allocation6], 1 }
 0xe02   :  { %1689 = vsyncpa [#allocation6 + $0x1], 1 }
 0xe03   :  { %1690 = vsyncpa [#allocation9], 1 }
 0xe04   :  { %1692 = vsyncpa [#allocation9 + $0x1], 1 }
 0xe05   :  { %1693 = vsyncpa [#allocation12], 1 }
 0xe06   :  { %1695 = vsyncpa [#allocation12 + $0x1], 1 }
 0xe07   :  { %1696 = vsyncpa [#allocation15], 1 }
 0xe08   :  { %1697 = vsyncpa [#allocation18], 1 }
 0xe09   :  { %1698 = vsyncpa [#allocation21], 1 }
 0xe0a   :  { %1699 = vsyncpa [#allocation24], 1 }
 0xe0b   :  { %1700 = vsyncpa [#allocation7], 1 }
 0xe0c   :  { %1702 = vsyncpa [#allocation7 + $0x1], 1 }

</bundles_post_ra>
